<compile_context>
chip_gen: v7x
topology: tpu7x:2x2x1
jax: 0.10.0
libtpu: 0.0.40
codegen_flags: <defaults>
</compile_context>

<pallas_src>
import functools
import numpy as np
import jax
import jax.numpy as jnp
from jax import lax
from jax.experimental import pallas as pl
from jax.experimental.pallas import tpu as pltpu

# ---------------- hyper-params (module defaults) ----------------
SR = 16000
N_FFT = 512
N_FREQ = N_FFT // 2 + 1      # 257
N_MELS = 40
N_MFCC = 20
WIN_LEN = 400
HOP = 160
AMIN = 1e-10
TOP_DB = 80.0
IN_EPS = 1e-5                # InstanceNorm2d eps

# ------------- MXU / lane friendly padded sizes + folded dB scale -------------
NFREQ_PAD = 384                        # 257 -> 3*128 (zero-padded freq columns)
MEL_PAD = 128                          # 40  -> 128
MFCC_PAD = 128                         # 20  -> 128 (lane-dense output, sliced in wrapper)
DB_SCALE = 10.0 / float(np.log(10.0))  # 10*log10(x) == DB_SCALE * ln(x)
TOP_DB_LN = float(TOP_DB / DB_SCALE)   # top_db threshold on raw ln values
LN_AMIN = float(np.log(AMIN))          # global floor of the ln-mel values


def _round_up(x, m):
    return ((x + m - 1) // m) * m


# ---------------- constant construction (deterministic, numpy) ----------------
def _hamming_window_periodic(n):
    i = np.arange(n, dtype=np.float64)
    return 0.54 - 0.46 * np.cos(2.0 * np.pi * i / n)


def _dft_matrices():
    win = np.zeros(N_FFT, dtype=np.float64)
    left = (N_FFT - WIN_LEN) // 2
    win[left:left + WIN_LEN] = _hamming_window_periodic(WIN_LEN)
    n = np.arange(N_FFT, dtype=np.float64)[:, None]
    k = np.arange(N_FREQ, dtype=np.float64)[None, :]
    ang = 2.0 * np.pi * n * k / N_FFT
    wr = (win[:, None] * np.cos(ang)).astype(np.float32)   # (NFFT, NFREQ)
    wi = (-win[:, None] * np.sin(ang)).astype(np.float32)  # (NFFT, NFREQ)
    return wr, wi


def _mel_fbanks():
    # torchaudio.functional.melscale_fbanks, htk scale, norm=None
    all_freqs = np.linspace(0.0, SR / 2.0, N_FREQ)
    def hz_to_mel(f): return 2595.0 * np.log10(1.0 + f / 700.0)
    def mel_to_hz(m): return 700.0 * (10.0 ** (m / 2595.0) - 1.0)
    m_pts = np.linspace(hz_to_mel(0.0), hz_to_mel(SR / 2.0), N_MELS + 2)
    f_pts = mel_to_hz(m_pts)
    f_diff = f_pts[1:] - f_pts[:-1]
    slopes = f_pts[None, :] - all_freqs[:, None]
    down = -slopes[:, :-2] / f_diff[:-1]
    up = slopes[:, 2:] / f_diff[1:]
    fb = np.maximum(0.0, np.minimum(down, up))
    return fb.astype(np.float32)                             # (NFREQ, NMELS)


def _dct_matrix():
    # torchaudio.functional.create_dct(n_mfcc, n_mels, norm='ortho')
    n = np.arange(N_MELS, dtype=np.float64)
    k = np.arange(N_MFCC, dtype=np.float64)[:, None]
    dct = np.cos(np.pi / N_MELS * (n + 0.5) * k)             # (NMFCC, NMELS)
    dct[0] *= 1.0 / np.sqrt(2.0)
    dct *= np.sqrt(2.0 / N_MELS)
    return dct.T.astype(np.float32)                          # (NMELS, NMFCC)


@functools.lru_cache(maxsize=1)
def _padded_constants_np():
    """W   : (512, 768)  == [Wre | Wim], freq padded 257->384 (re/im on lane boundaries).
       FB2 : (768, 128)  == [FB ; FB]  -> dot(s*s, FB2) == (re^2+im^2) @ FB (fold the add).
       DCT : (128, 128)  DCT-II with 10/ln(10) dB scale folded in, zero-padded rows/cols."""
    wr, wi = _dft_matrices()
    w = np.zeros((N_FFT, 2 * NFREQ_PAD), np.float32)
    w[:, :N_FREQ] = wr
    w[:, NFREQ_PAD:NFREQ_PAD + N_FREQ] = wi

    fb = _mel_fbanks()
    fb2 = np.zeros((2 * NFREQ_PAD, MEL_PAD), np.float32)
    fb2[:N_FREQ, :N_MELS] = fb
    fb2[NFREQ_PAD:NFREQ_PAD + N_FREQ, :N_MELS] = fb

    dct = np.zeros((MEL_PAD, MFCC_PAD), np.float32)
    dct[:N_MELS, :N_MFCC] = _dct_matrix() * DB_SCALE
    return w, fb2, dct


def _padded_constants():
    w, fb2, dct = _padded_constants_np()
    return (jnp.asarray(w, jnp.bfloat16),
            jnp.asarray(fb2, jnp.bfloat16),
            jnp.asarray(dct, jnp.float32))


def _frame_signal(x, dtype=jnp.bfloat16):
    """(B, T, 1) -> (B, n_frames, N_FFT) frames (center=True, reflect pad), in `dtype`.

    The cast happens BEFORE the reflect-pad + gather so XLA materializes the 3.2x-expanded
    frame tensor only once, already in bf16 (reflect/gather only copy values)."""
    B, T, _ = x.shape
    sig = x[..., 0].astype(dtype)
    pad = N_FFT // 2
    padded = jnp.pad(sig, ((0, 0), (pad, pad)), mode="reflect")
    n_frames = 1 + T // HOP
    idx = np.arange(n_frames)[:, None] * HOP + np.arange(N_FFT)[None, :]
    return padded[:, idx], n_frames


# ---------------- Pallas kernel ----------------
def _mfcc_kernel(frames_ref, w_ref, fb2_ref, dct_ref, o_ref, logmel_ref, mx_ref,
                 *, n_frames, tile_f, f_pad):
    t = pl.program_id(1)

    # Reset the running column-wise max at the first frame tile of each batch item.
    # Every ln-mel value is >= ln(AMIN), so ln(AMIN) is a safe "-inf".
    @pl.when(t == 0)
    def _():
        mx_ref[...] = jnp.full_like(mx_ref, LN_AMIN)

    # --- phase 1 (every frame tile): STFT -> power -> mel -> ln  (bf16 MXU feed) ---
    frames = frames_ref[0]                                       # (tile_f, 512) bf16
    s = jnp.dot(frames, w_ref[...], preferred_element_type=jnp.float32)   # (tile_f, 768)
    # [FB;FB] folds re^2+im^2 into the matmul: no lane slices, no VPU add.
    mel = jnp.dot((s * s).astype(jnp.bfloat16), fb2_ref[...],
                  preferred_element_type=jnp.float32)            # (tile_f, 128)
    y = jnp.log(jnp.maximum(mel, AMIN))                          # ln-scale log-mel (EUP)

    row0 = pl.multiple_of(t * tile_f, tile_f)
    logmel_ref[pl.ds(row0, tile_f), :] = y
    # Running per-lane max (XLU, hidden under the MXU work) -> no full-plane rescan later.
    mx_ref[...] = jnp.maximum(mx_ref[...], jnp.max(y, axis=0, keepdims=True))

    # --- phase 2 (last tile only): global top_db clamp, DCT, InstanceNorm2d(1) ---
    @pl.when(t == pl.num_programs(1) - 1)
    def _():
        y_all = logmel_ref[...]                                  # (f_pad, MEL_PAD)
        # Padded frames / padded mel columns sit at ln(AMIN) (global floor) -> they
        # can never raise the max.
        m = jnp.max(mx_ref[...])
        y_c = jnp.maximum(y_all, m - TOP_DB_LN)
        # dct_ref already carries the 10/ln(10) dB multiplier (folded in).
        mfcc = jnp.dot(y_c, dct_ref[...], preferred_element_type=jnp.float32)

        # InstanceNorm2d(1): biased mean/var over the VALID (n_mfcc, time) plane only,
        # in a single masked sum / sum-of-squares pass.
        rows = lax.broadcasted_iota(jnp.int32, (f_pad, MFCC_PAD), 0)
        cols = lax.broadcasted_iota(jnp.int32, (f_pad, MFCC_PAD), 1)
        valid = (rows < n_frames) & (cols < N_MFCC)
        inv_cnt = 1.0 / float(n_frames * N_MFCC)
        mval = jnp.where(valid, mfcc, 0.0)
        mean = jnp.sum(mval) * inv_cnt
        ex2 = jnp.sum(mval * mfcc) * inv_cnt                     # sum(mfcc^2) over valid
        var = jnp.maximum(ex2 - mean * mean, 0.0)
        o_ref[0] = (mfcc - mean) * lax.rsqrt(var + IN_EPS)


def _vmem_limit_bytes():
    """Generation-aware scoped-VMEM limit: 3/4 of physical capacity (48 MiB fallback)."""
    try:
        cap = int(pltpu.get_tpu_info().vmem_capacity_bytes)
    except Exception:
        cap = 64 * 1024 * 1024
    return int(min(max(cap * 3 // 4, 32 * 1024 * 1024), 96 * 1024 * 1024))


@jax.jit
def mfcc_forward(x):
    """x: (B, T, 1) float32 waveform -> (B, n_frames, n_mfcc) float32."""
    B, T, C = x.shape
    assert C == 1, "module's final rearrange 'b 1 c t -> b t c' implies 1 audio channel"
    frames, n_frames = _frame_signal(x, jnp.bfloat16)            # (B, n_frames, 512) bf16

    # Frame-axis padding / tiling: single tile for short/medium clips, 1024-frame tiles
    # (multiple of 256, amortizes per-grid-step overhead on v6e/v7x) for long clips.
    f_pad16 = _round_up(n_frames, 16)
    if f_pad16 <= 2048:
        tile_f, f_pad = f_pad16, f_pad16
    else:
        tile_f = 1024
        f_pad = _round_up(n_frames, tile_f)
    n_ftiles = f_pad // tile_f

    # Zero frames land on the ln(AMIN) floor -> cannot change the top_db max, and are
    # masked out of the InstanceNorm statistics.
    frames = jnp.pad(frames, ((0, 0), (0, f_pad - n_frames), (0, 0)))

    w, fb2, dct = _padded_constants()

    kernel = functools.partial(_mfcc_kernel, n_frames=n_frames,
                               tile_f=tile_f, f_pad=f_pad)

    # Batch axis is "parallel" (megacore-shardable); the frame-tile axis is sequential
    # ("arbitrary") because of the global top_db clamp / InstanceNorm.
    out_pad = pl.pallas_call(
        kernel,
        out_shape=jax.ShapeDtypeStruct((B, f_pad, MFCC_PAD), jnp.float32),
        grid=(B, n_ftiles),
        in_specs=[
            pl.BlockSpec((1, tile_f, N_FFT), lambda b, t: (b, t, 0)),
            pl.BlockSpec((N_FFT, 2 * NFREQ_PAD), lambda b, t: (0, 0)),
            pl.BlockSpec((2 * NFREQ_PAD, MEL_PAD), lambda b, t: (0, 0)),
            pl.BlockSpec((MEL_PAD, MFCC_PAD), lambda b, t: (0, 0)),
        ],
        out_specs=pl.BlockSpec((1, f_pad, MFCC_PAD), lambda b, t: (b, 0, 0)),
        scratch_shapes=[pltpu.VMEM((f_pad, MEL_PAD), jnp.float32),   # staged log-mel
                        pltpu.VMEM((1, MEL_PAD), jnp.float32)],      # running max
        compiler_params=pltpu.CompilerParams(
            dimension_semantics=("parallel", "arbitrary"),
            vmem_limit_bytes=_vmem_limit_bytes()),
    )(frames, w, fb2, dct)

    return out_pad[:, :n_frames, :N_MFCC]


# ---------------- pure-JAX references (for sanity check) ----------------
def mfcc_reference_f32(x):
    """Exact f32 module semantics (torchaudio MFCC + InstanceNorm2d(1))."""
    frames, _ = _frame_signal(x, jnp.float32)
    wr, wi = _dft_matrices()
    fb = _mel_fbanks()
    dct = _dct_matrix()
    re = frames @ wr
    im = frames @ wi
    power = re * re + im * im
    mel = power @ fb
    x_db = 10.0 * jnp.log10(jnp.maximum(mel, AMIN))
    x_db = jnp.maximum(x_db, jnp.max(x_db, axis=(1, 2), keepdims=True) - TOP_DB)
    mfcc = x_db @ dct
    mean = jnp.mean(mfcc, axis=(1, 2), keepdims=True)
    var = jnp.mean((mfcc - mean) ** 2, axis=(1, 2), keepdims=True)
    return (mfcc - mean) / jnp.sqrt(var + IN_EPS)


def mfcc_reference_bf16(x):
    """Pure-JAX reference mirroring the kernel's bf16 MXU feed and folded constants."""
    frames, _ = _frame_signal(x, jnp.bfloat16)
    w, fb2, dct = _padded_constants()
    s = jnp.dot(frames, w, preferred_element_type=jnp.float32)
    mel = jnp.dot((s * s).astype(jnp.bfloat16), fb2, preferred_element_type=jnp.float32)
    y = jnp.log(jnp.maximum(mel, AMIN))
    y = jnp.maximum(y, jnp.max(y, axis=(1, 2), keepdims=True) - TOP_DB_LN)
    mfcc = jnp.dot(y, dct)[:, :, :N_MFCC]
    mean = jnp.mean(mfcc, axis=(1, 2), keepdims=True)
    var = jnp.mean((mfcc - mean) ** 2, axis=(1, 2), keepdims=True)
    return (mfcc - mean) / jnp.sqrt(var + IN_EPS)


if __name__ == "__main__":
    key = jax.random.PRNGKey(0)
    B, T = 2, 1600                       # 1600 samples -> 11 STFT frames
    x = jax.random.normal(key, (B, T, 1), dtype=jnp.float32)

    out = jax.block_until_ready(mfcc_forward(x))
    ref_bf16 = jax.block_until_ready(mfcc_reference_bf16(x))
    ref_f32 = jax.block_until_ready(mfcc_reference_f32(x))

    n_frames = 1 + T // HOP
    assert out.shape == (B, n_frames, N_MFCC)
    assert bool(jnp.all(jnp.isfinite(out)))

    # Tight check against a reference with the same bf16 MXU feed (kernel plumbing).
    np.testing.assert_allclose(np.asarray(out), np.asarray(ref_bf16),
                               rtol=2e-3, atol=2e-3)
    # Looser check against exact f32 module semantics (only deviation is the
    # intentional bf16 quantization of the STFT / mel matmuls).
    np.testing.assert_allclose(np.asarray(out), np.asarray(ref_f32),
                               rtol=2e-2, atol=2e-2)
    print("KERNEL_OK")
</pallas_src>

<mosaic_0001>
module attributes {stable_mosaic.version = 11 : i64} {
  func.func @_mfcc_kernel(%arg0: i32, %arg1: i32, %arg2: memref<1x16x512xbf16, #tpu.memory_space<vmem>>, %arg3: memref<512x768xbf16, #tpu.memory_space<vmem>>, %arg4: memref<768x128xbf16, #tpu.memory_space<vmem>>, %arg5: memref<128x128xf32, #tpu.memory_space<vmem>>, %arg6: memref<1x16x128xf32, #tpu.memory_space<vmem>>, %arg7: memref<16x128xf32, #tpu.memory_space<vmem>>, %arg8: memref<1x128xf32, #tpu.memory_space<vmem>>) attributes {dimension_semantics = [#tpu.dimension_semantics<parallel>, #tpu.dimension_semantics<arbitrary>], iteration_bounds = array<i64: 2, 1>, scalar_prefetch = 0 : i64, scratch_operands = 2 : i64, tpu.core_type = #tpu.core_type<tc>, window_params = [{transform_indices = @transform_0, window_bounds = array<i64: 1, 16, 512>}, {pipeline_mode = #tpu.pipeline_mode<synchronous>, transform_indices = @transform_1, window_bounds = array<i64: 512, 768>}, {pipeline_mode = #tpu.pipeline_mode<synchronous>, transform_indices = @transform_2, window_bounds = array<i64: 768, 128>}, {pipeline_mode = #tpu.pipeline_mode<synchronous>, transform_indices = @transform_3, window_bounds = array<i64: 128, 128>}, {transform_indices = @transform_4, window_bounds = array<i64: 1, 16, 128>}]} {
    %c0_i32 = arith.constant 0 : i32
    %0 = arith.cmpi eq, %arg1, %c0_i32 : i32
    %1 = arith.extui %0 : i1 to i32
    %c0_i32_0 = arith.constant 0 : i32
    %2 = arith.cmpi ne, %1, %c0_i32_0 : i32
    scf.if %2 {
      %cst_17 = arith.constant -23.0258503 : f32
      %26 = vector.broadcast %cst_17 : f32 to vector<1x128xf32>
      %c0_18 = arith.constant 0 : index
      %c0_19 = arith.constant 0 : index
      %27 = vector.load %arg8[%c0_18, %c0_19] : memref<1x128xf32, #tpu.memory_space<vmem>>, vector<1x128xf32>
      tpu.vector_store %arg8[%c0_18, %c0_19], %26 {strides = array<i32>} : memref<1x128xf32, #tpu.memory_space<vmem>>, vector<1x128xf32>,
    } else {
    }
    %c0 = arith.constant 0 : index
    %c0_1 = arith.constant 0 : index
    %c0_2 = arith.constant 0 : index
    %3 = vector.load %arg2[%c0, %c0_1, %c0_2] : memref<1x16x512xbf16, #tpu.memory_space<vmem>>, vector<1x16x512xbf16>
    %4 = vector.shape_cast %3 : vector<1x16x512xbf16> to vector<16x512xbf16>
    %c0_3 = arith.constant 0 : index
    %c0_4 = arith.constant 0 : index
    %5 = vector.load %arg3[%c0_3, %c0_4] : memref<512x768xbf16, #tpu.memory_space<vmem>>, vector<512x768xbf16>
    %cst = arith.constant dense<0.000000e+00> : vector<16x768xf32>
    %6 = tpu.matmul %4, %5, %cst {dimension_numbers = #tpu.dot_dimension_numbers<[1], [0], [0], [1], [0, 0, 1, 1], [], []>} : vector<16x512xbf16>, vector<512x768xbf16>, vector<16x768xf32> -> vector<16x768xf32>
    %7 = arith.mulf %6, %6 : vector<16x768xf32>
    %8 = arith.truncf %7 : vector<16x768xf32> to vector<16x768xbf16>
    %c0_5 = arith.constant 0 : index
    %c0_6 = arith.constant 0 : index
    %9 = vector.load %arg4[%c0_5, %c0_6] : memref<768x128xbf16, #tpu.memory_space<vmem>>, vector<768x128xbf16>
    %cst_7 = arith.constant dense<0.000000e+00> : vector<16x128xf32>
    %10 = tpu.matmul %8, %9, %cst_7 {dimension_numbers = #tpu.dot_dimension_numbers<[1], [0], [0], [1], [0, 0, 1, 1], [], []>} : vector<16x768xbf16>, vector<768x128xbf16>, vector<16x128xf32> -> vector<16x128xf32>
    %cst_8 = arith.constant 1.000000e-10 : f32
    %11 = vector.broadcast %cst_8 : f32 to vector<16x128xf32>
    %12 = arith.maximumf %10, %11 : vector<16x128xf32>
    %13 = math.log %12 : vector<16x128xf32>
    %c16_i32 = arith.constant 16 : i32
    %14 = arith.muli %arg1, %c16_i32 : i32
    %15 = tpu.assume_multiple %14, 16 : i32
    %16 = arith.index_cast %15 : i32 to index
    %c0_9 = arith.constant 0 : index
    %17 = vector.load %arg7[%16, %c0_9] : memref<16x128xf32, #tpu.memory_space<vmem>>, vector<16x128xf32>
    tpu.vector_store %arg7[%16, %c0_9], %13 {strides = array<i32>} : memref<16x128xf32, #tpu.memory_space<vmem>>, vector<16x128xf32>,
    %c0_10 = arith.constant 0 : index
    %c0_11 = arith.constant 0 : index
    %18 = vector.load %arg8[%c0_10, %c0_11] : memref<1x128xf32, #tpu.memory_space<vmem>>, vector<1x128xf32>
    %cst_12 = arith.constant dense<0xFF800000> : vector<128xf32>
    %19 = vector.multi_reduction <maximumf>, %13, %cst_12 [0] : vector<16x128xf32> to vector<128xf32>
    %20 = vector.shape_cast %19 : vector<128xf32> to vector<1x128xf32>
    %21 = arith.maximumf %18, %20 : vector<1x128xf32>
    %c0_13 = arith.constant 0 : index
    %c0_14 = arith.constant 0 : index
    %22 = vector.load %arg8[%c0_13, %c0_14] : memref<1x128xf32, #tpu.memory_space<vmem>>, vector<1x128xf32>
    tpu.vector_store %arg8[%c0_13, %c0_14], %21 {strides = array<i32>} : memref<1x128xf32, #tpu.memory_space<vmem>>, vector<1x128xf32>,
    %c0_i32_15 = arith.constant 0 : i32
    %23 = arith.cmpi eq, %arg1, %c0_i32_15 : i32
    %24 = arith.extui %23 : i1 to i32
    %c0_i32_16 = arith.constant 0 : i32
    %25 = arith.cmpi ne, %24, %c0_i32_16 : i32
    scf.if %25 {
      %c0_17 = arith.constant 0 : index
      %c0_18 = arith.constant 0 : index
      %26 = vector.load %arg7[%c0_17, %c0_18] : memref<16x128xf32, #tpu.memory_space<vmem>>, vector<16x128xf32>
      %c0_19 = arith.constant 0 : index
      %c0_20 = arith.constant 0 : index
      %27 = vector.load %arg8[%c0_19, %c0_20] : memref<1x128xf32, #tpu.memory_space<vmem>>, vector<1x128xf32>
      %28 = vector.shape_cast %27 : vector<1x128xf32> to vector<1x1x128xf32>
      %cst_21 = arith.constant dense<0xFF800000> : vector<1xf32>
      %29 = vector.multi_reduction <maximumf>, %28, %cst_21 [1, 2] : vector<1x1x128xf32> to vector<1xf32>
      %30 = vector.shape_cast %29 : vector<1xf32> to vector<1x1x1xf32>
      %31 = vector.extract %30[0, 0, 0] : f32 from vector<1x1x1xf32>
      %cst_22 = arith.constant 18.420681 : f32
      %32 = arith.subf %31, %cst_22 : f32
      %33 = vector.broadcast %32 : f32 to vector<16x128xf32>
      %34 = arith.maximumf %26, %33 : vector<16x128xf32>
      %c0_23 = arith.constant 0 : index
      %c0_24 = arith.constant 0 : index
      %35 = vector.load %arg5[%c0_23, %c0_24] : memref<128x128xf32, #tpu.memory_space<vmem>>, vector<128x128xf32>
      %cst_25 = arith.constant dense<0.000000e+00> : vector<16x128xf32>
      %36 = tpu.matmul %34, %35, %cst_25 {dimension_numbers = #tpu.dot_dimension_numbers<[1], [0], [0], [1], [0, 0, 1, 1], [], []>} : vector<16x128xf32>, vector<128x128xf32>, vector<16x128xf32> -> vector<16x128xf32>
      %37 = tpu.iota {dimensions = array<i32: 0>} : vector<16x128xi32>
      %38 = tpu.iota {dimensions = array<i32: 1>} : vector<16x128xi32>
      %c11_i32 = arith.constant 11 : i32
      %39 = vector.broadcast %c11_i32 : i32 to vector<16x128xi32>
      %40 = arith.cmpi slt, %37, %39 : vector<16x128xi32>
      %c20_i32 = arith.constant 20 : i32
      %41 = vector.broadcast %c20_i32 : i32 to vector<16x128xi32>
      %42 = arith.cmpi slt, %38, %41 : vector<16x128xi32>
      %43 = arith.andi %40, %42 : vector<16x128xi1>
      %cst_26 = arith.constant 0.000000e+00 : f32
      %44 = vector.broadcast %cst_26 : f32 to vector<16x128xf32>
      %45 = arith.select %43, %36, %44 : vector<16x128xi1>, vector<16x128xf32>
      %46 = vector.shape_cast %45 : vector<16x128xf32> to vector<1x16x128xf32>
      %cst_27 = arith.constant dense<0.000000e+00> : vector<1xf32>
      %47 = vector.multi_reduction <add>, %46, %cst_27 [1, 2] : vector<1x16x128xf32> to vector<1xf32>
      %48 = vector.shape_cast %47 : vector<1xf32> to vector<1x1x1xf32>
      %49 = vector.extract %48[0, 0, 0] : f32 from vector<1x1x1xf32>
      %cst_28 = arith.constant 0.0045454544 : f32
      %50 = arith.mulf %49, %cst_28 : f32
      %51 = arith.mulf %45, %36 : vector<16x128xf32>
      %52 = vector.shape_cast %51 : vector<16x128xf32> to vector<1x16x128xf32>
      %cst_29 = arith.constant dense<0.000000e+00> : vector<1xf32>
      %53 = vector.multi_reduction <add>, %52, %cst_29 [1, 2] : vector<1x16x128xf32> to vector<1xf32>
      %54 = vector.shape_cast %53 : vector<1xf32> to vector<1x1x1xf32>
      %55 = vector.extract %54[0, 0, 0] : f32 from vector<1x1x1xf32>
      %cst_30 = arith.constant 0.0045454544 : f32
      %56 = arith.mulf %55, %cst_30 : f32
      %57 = arith.mulf %50, %50 : f32
      %58 = arith.subf %56, %57 : f32
      %cst_31 = arith.constant 0.000000e+00 : f32
      %59 = arith.maximumf %58, %cst_31 : f32
      %60 = vector.broadcast %50 : f32 to vector<16x128xf32>
      %61 = arith.subf %36, %60 : vector<16x128xf32>
      %cst_32 = arith.constant 9.99999974E-6 : f32
      %62 = arith.addf %59, %cst_32 : f32
      %63 = math.rsqrt %62 : f32
      %64 = vector.broadcast %63 : f32 to vector<16x128xf32>
      %65 = arith.mulf %61, %64 : vector<16x128xf32>
      %c0_33 = arith.constant 0 : index
      %c0_34 = arith.constant 0 : index
      %c0_35 = arith.constant 0 : index
      %66 = vector.load %arg6[%c0_33, %c0_34, %c0_35] : memref<1x16x128xf32, #tpu.memory_space<vmem>>, vector<1x16x128xf32>
      %67 = vector.shape_cast %66 : vector<1x16x128xf32> to vector<16x128xf32>
      %68 = vector.shape_cast %65 : vector<16x128xf32> to vector<1x16x128xf32>
      tpu.vector_store %arg6[%c0_33, %c0_34, %c0_35], %68 {strides = array<i32>} : memref<1x16x128xf32, #tpu.memory_space<vmem>>, vector<1x16x128xf32>,
    } else {
    }
    return
  }
  func.func @transform_0(%arg0: i32, %arg1: i32) -> (i32, i32, i32) {
    %c0_i32 = arith.constant 0 : i32
    %c0_i32_0 = arith.constant 0 : i32
    return %arg0, %arg1, %c0_i32 : i32, i32, i32
  }
  func.func @transform_1(%arg0: i32, %arg1: i32) -> (i32, i32) {
    %c0_i32 = arith.constant 0 : i32
    %c0_i32_0 = arith.constant 0 : i32
    %c0_i32_1 = arith.constant 0 : i32
    return %c0_i32, %c0_i32_0 : i32, i32
  }
  func.func @transform_2(%arg0: i32, %arg1: i32) -> (i32, i32) {
    %c0_i32 = arith.constant 0 : i32
    %c0_i32_0 = arith.constant 0 : i32
    %c0_i32_1 = arith.constant 0 : i32
    return %c0_i32, %c0_i32_0 : i32, i32
  }
  func.func @transform_3(%arg0: i32, %arg1: i32) -> (i32, i32) {
    %c0_i32 = arith.constant 0 : i32
    %c0_i32_0 = arith.constant 0 : i32
    %c0_i32_1 = arith.constant 0 : i32
    return %c0_i32, %c0_i32_0 : i32, i32
  }
  func.func @transform_4(%arg0: i32, %arg1: i32) -> (i32, i32, i32) {
    %c0_i32 = arith.constant 0 : i32
    %c0_i32_0 = arith.constant 0 : i32
    %c0_i32_1 = arith.constant 0 : i32
    return %arg0, %c0_i32, %c0_i32_0 : i32, i32, i32
  }
}

</mosaic_0001>

<bundles_post_ra>
// kernel: mfcc_forward.1
= control target key start
LH: loop header
LB: loop body
LE: loop exit
PB: predicated region body
PF: predicated region fallthrough
CT: control target
= control target key end

     0   :  { %s3305_s15 = smov 0   ;;  %s3307_s16 = smov 0   ;;  %s4148_s0 = inlined_call_operand.vmem [shape: bf16[2,16,512], index: 0, kind: input, shape index: {}]   ;;  %s4149_s1 = inlined_call_operand.vmem [shape: bf16[512,768], index: 1, kind: input, shape index: {}]   ;;  %s4150_s2 = inlined_call_operand.vmem [shape: bf16[768,128], index: 2, kind: input, shape index: {}]   ;;  %s4151_s3 = inlined_call_operand.vmem [shape: f32[128,128], index: 3, kind: input, shape index: {}]   ;;  %s4152_s4 = inlined_call_operand.vmem [shape: f32[2,16,128], index: 4, kind: output, shape index: {}]  }
   0x1   :  { %s3309_s17 = smov 0  }
   0x2 LB: > { %s26_s18 = sadd.s32 1, %s3272_s16  ;;  %p2455_p0 = scmp.ge.s32.totalorder %s3276_s17, 1  ;;  %s3276_s17 = sphi %s3309_s17, %s14_s17   ;;  %s3272_s16 = sphi %s3307_s16, %s4154_s16   ;;  %s3268_s15 = sphi %s3305_s15, %s4153_s15  }
   0x3   : > { %p28_p1 = scmp.ge.s32.totalorder %s26_s18, 2  ;;  %p182_p2 = scmp.lt.s32.totalorder %s3276_s17, 3 }
   0x5   : > { %s4156_s18 = smov (%p28_p1, %s26_s18), 0  ;;  %p183_p3 = pnand %p2455_p0, %p182_p2 }
   0x6   : > { %v2906_v0 = vld [vmem:[%s4149_s1 + $0x4] ss:$24 sps:$4 sm:$0xff] (!%p183_p3)   ;;  %v2908_v1 = vld [vmem:[%s4149_s1] ss:$24 sps:$4 sm:$0xff] (!%p183_p3)   ;;  %v2909_v2 = vld [vmem:[%s4149_s1 + $0x34] ss:$24 sps:$4 sm:$0xff] (!%p183_p3)  }
   0x7   : > { %186 = sbr.rel (%p183_p3) target bundleno = 1448 (0x5a8), region = 36  ;;  %1411 = vmatprep.subr.bf16.mxu0 (!%p183_p3), %v2906_v0  ;;  %v2911_v3 = vld [vmem:[%s4149_s1 + $0x30] ss:$24 sps:$4 sm:$0xff] (!%p183_p3)   ;;  %v2912_v4 = vld [vmem:[%s4149_s1 + $0x64] ss:$24 sps:$4 sm:$0xff] (!%p183_p3)   ;;  %p214_p4 = scmp.lt.s32.totalorder (!%p183_p3), %s3268_s15, 1 }
   0x8   : > { %1412 = vmatpush1.bf16.msra.mxu0 (!%p183_p3), %v2908_v1  ;;  %v2914_v5 = vld [vmem:[%s4149_s1 + $0x60] ss:$24 sps:$4 sm:$0xff] (!%p183_p3)   ;;  %v2915_v6 = vld [vmem:[%s4149_s1 + $0x94] ss:$24 sps:$4 sm:$0xff] (!%p183_p3)   ;;  %v2917_v7 = vld [vmem:[%s4149_s1 + $0x90] ss:$24 sps:$4 sm:$0xff] (!%p183_p3)  }
   0x9   : > { %1413 = vmatprep.subr.bf16.mxu0 (!%p183_p3), %v2909_v2  ;;  %v2930_v8 = vld [vmem:[%s4149_s1 + $0xc] ss:$24 sps:$4 sm:$0xff] (!%p183_p3)   ;;  %v2934_v10 = vld [vmem:[%s4149_s1 + $0x8] ss:$24 sps:$4 sm:$0xff] (!%p183_p3)   ;;  %v2936_v11 = vld [vmem:[%s4149_s1 + $0x3c] ss:$24 sps:$4 sm:$0xff] (!%p183_p3)  }
   0xa   : > { %v2918_v9 = vld [vmem:[%s4149_s1 + $0xc4] ss:$24 sps:$4 sm:$0xff] (!%p183_p3)   ;;  %1497 = vmatprep.subr.bf16.mxu1 (!%p183_p3), %v2930_v8  ;;  %v2920_v12 = vld [vmem:[%s4149_s1 + $0xc0] ss:$24 sps:$4 sm:$0xff] (!%p183_p3)   ;;  %v2921_v13 = vld [vmem:[%s4149_s1 + $0xf4] ss:$24 sps:$4 sm:$0xff] (!%p183_p3)  }
   0xb   : > { %1498 = vmatpush1.bf16.msra.mxu1 (!%p183_p3), %v2934_v10  ;;  %v2940_v14 = vld [vmem:[%s4149_s1 + $0x38] ss:$24 sps:$4 sm:$0xff] (!%p183_p3)   ;;  %v2942_v15 = vld [vmem:[%s4149_s1 + $0x6c] ss:$24 sps:$4 sm:$0xff] (!%p183_p3)   ;;  %v2946_v17 = vld [vmem:[%s4149_s1 + $0x68] ss:$24 sps:$4 sm:$0xff] (!%p183_p3)  }
   0xc   : > { %1414 = vmatpush1.bf16.msra.mxu0 (!%p183_p3), %v2911_v3  ;;  %1499 = vmatprep.subr.bf16.mxu1 (!%p183_p3), %v2936_v11  ;;  %v2923_v16 = vld [vmem:[%s4149_s1 + $0xf0] ss:$24 sps:$4 sm:$0xff] (!%p183_p3)   ;;  %v2948_v18 = vld [vmem:[%s4149_s1 + $0x9c] ss:$24 sps:$4 sm:$0xff] (!%p183_p3)   ;;  %v2926_v21 = vld [vmem:[%s4149_s1 + $0x120] ss:$24 sps:$4 sm:$0xff] (!%p183_p3)  }
   0xd   : > { %1415 = vmatprep.subr.bf16.mxu0 (!%p183_p3), %v2912_v4  ;;  %v2924_v19 = vld [vmem:[%s4149_s1 + $0x124] ss:$24 sps:$4 sm:$0xff] (!%p183_p3)   ;;  %v2952_v20 = vld [vmem:[%s4149_s1 + $0x98] ss:$24 sps:$4 sm:$0xff] (!%p183_p3)   ;;  %v2927_v23 = vld [vmem:[%s4149_s1 + $0x154] ss:$24 sps:$4 sm:$0xff] (!%p183_p3)  }
   0xe   : > { %v2954_v22 = vld [vmem:[%s4149_s1 + $0xcc] ss:$24 sps:$4 sm:$0xff]   ;;  %s4158_s15 = smov (!%p214_p4, %s3268_s15), 1  ;;  %v2929_v24 = vld [vmem:[%s4149_s1 + $0x150] ss:$24 sps:$4 sm:$0xff]   ;;  %vm2220_vm0 = vcmask 1040384  }
   0xf   : > { %1500 = vmatpush1.bf16.msra.mxu1 %v2940_v14  ;;  %v2958_v25 = vld [vmem:[%s4149_s1 + $0xc8] ss:$24 sps:$4 sm:$0xff]   ;;  %v2960_v26 = vld [vmem:[%s4149_s1 + $0xfc] ss:$24 sps:$4 sm:$0xff]   ;;  %s2707_s29 = sshll.u32 %s4158_s15, 5  ;;  %s2708_s26 = sshll.u32 %s4158_s15, 4 }
  0x10   : > { %1416 = vmatpush1.bf16.msra.mxu0 %v2914_v5  ;;  %1501 = vmatprep.subr.bf16.mxu1 %v2942_v15  ;;  %v2932_v27 = vld [vmem:[%s4149_s1 + $0x184] ss:$24 sps:$4 sm:$0xff]   ;;  %v2964_v28 = vld [vmem:[%s4149_s1 + $0xf8] ss:$24 sps:$4 sm:$0xff]   ;;  %s3420_s10 = scalar_lea.vmem %s4148_s0, %s2707_s29  ;;  %v2938_v31 = vld [vmem:[%s4149_s1 + $0x1b4] ss:$24 sps:$4 sm:$0xff]   ;;  %s228_s30 = scalar_lea.vmem %s4152_s4, %s2708_s26 }
  0x11   : > { %1417 = vmatprep.subr.bf16.mxu0 %v2915_v6  ;;  %v2935_v29 = vld [vmem:[%s4149_s1 + $0x180] ss:$24 sps:$4 sm:$0xff]   ;;  %v2966_v30 = vld [vmem:[%s4149_s1 + $0x12c] ss:$24 sps:$4 sm:$0xff]   ;;  %v2941_v34 = vld [vmem:[%s4149_s1 + $0x1b0] ss:$24 sps:$4 sm:$0xff]  }
  0x12   : > { %v3432_v32 = vld [vmem:[%s3420_s10 + $0x4] ss:$16 sps:$4 sm:$0xff]   ;;  %v2970_v33 = vld [vmem:[%s4149_s1 + $0x128] ss:$24 sps:$4 sm:$0xff]   ;;  %v2976_v38 = vld [vmem:[%s4149_s1 + $0x158] ss:$24 sps:$4 sm:$0xff]  }
  0x13   : > { %1502 = vmatpush1.bf16.msra.mxu1 %v2946_v17  ;;  %v2972_v35 = vld [vmem:[%s4149_s1 + $0x15c] ss:$24 sps:$4 sm:$0xff]   ;;  %1443 = vmatprep.mubr.bf16.mxu0 %v3432_v32  ;;  %v2947_v37 = vld [vmem:[%s4149_s1 + $0x1e0] ss:$24 sps:$4 sm:$0xff]   ;;  %v2978_v39 = vld [vmem:[%s4149_s1 + $0x18c] ss:$24 sps:$4 sm:$0xff]  }
  0x14   : > { %1418 = vmatpush1.bf16.msra.mxu0 %v2917_v7  ;;  %1503 = vmatprep.subr.bf16.mxu1 %v2948_v18  ;;  %v2944_v36 = vld [vmem:[%s4149_s1 + $0x1e4] ss:$24 sps:$4 sm:$0xff]   ;;  %v2950_v40 = vld [vmem:[%s4149_s1 + $0x214] ss:$24 sps:$4 sm:$0xff]   ;;  %v2985_v41 = vld [vmem:[%s4149_s1 + $0x188] ss:$24 sps:$4 sm:$0xff]  }
  0x15   : > { %1419 = vmatprep.subr.bf16.mxu0 %v2918_v9  ;;  %1529 = vmatprep.mubr.bf16.mxu1 %v3432_v32  ;;  %v2953_v42 = vld [vmem:[%s4149_s1 + $0x210] ss:$24 sps:$4 sm:$0xff]   ;;  %v2987_v43 = vld [vmem:[%s4149_s1 + $0x1bc] ss:$24 sps:$4 sm:$0xff]   ;;  %v2959_v45 = vld [vmem:[%s4149_s1 + $0x240] ss:$24 sps:$4 sm:$0xff]  }
  0x16   : > { %v2956_v44 = vld [vmem:[%s4149_s1 + $0x244] ss:$24 sps:$4 sm:$0xff]   ;;  %v2992_v46 = vld [vmem:[%s4149_s1 + $0x1b8] ss:$24 sps:$4 sm:$0xff]   ;;  %v2962_v48 = vld [vmem:[%s4149_s1 + $0x274] ss:$24 sps:$4 sm:$0xff]  }
  0x17   : > { %1504 = vmatpush1.bf16.msra.mxu1 %v2952_v20  ;;  %v2993_v47 = vld [vmem:[%s4149_s1 + $0x1ec] ss:$24 sps:$4 sm:$0xff]   ;;  %v2998_v49 = vld [vmem:[%s4149_s1 + $0x1e8] ss:$24 sps:$4 sm:$0xff]   ;;  %v2999_v51 = vld [vmem:[%s4149_s1 + $0x21c] ss:$24 sps:$4 sm:$0xff]  }
  0x18   : > { %1420 = vmatpush1.bf16.msra.mxu0 %v2920_v12  ;;  %1505 = vmatprep.subr.bf16.mxu1 %v2954_v22  ;;  %v2965_v50 = vld [vmem:[%s4149_s1 + $0x270] ss:$24 sps:$4 sm:$0xff]   ;;  %v2968_v52 = vld [vmem:[%s4149_s1 + $0x2a4] ss:$24 sps:$4 sm:$0xff]   ;;  %v2971_v54 = vld [vmem:[%s4149_s1 + $0x2a0] ss:$24 sps:$4 sm:$0xff]  }
  0x19   : > { %1421 = vmatprep.subr.bf16.mxu0 %v2921_v13  ;;  %v3004_v53 = vld [vmem:[%s4149_s1 + $0x218] ss:$24 sps:$4 sm:$0xff]   ;;  %v3005_v55 = vld [vmem:[%s4149_s1 + $0x24c] ss:$24 sps:$4 sm:$0xff]   ;;  %v3010_v57 = vld [vmem:[%s4149_s1 + $0x248] ss:$24 sps:$4 sm:$0xff]  }
  0x1a   : > { %v2974_v56 = vld [vmem:[%s4149_s1 + $0x2d4] ss:$24 sps:$4 sm:$0xff]   ;;  %v2977_v58 = vld [vmem:[%s4149_s1 + $0x2d0] ss:$24 sps:$4 sm:$0xff]   ;;  %v2984_v60 = vld [vmem:[%s4149_s1 + $0x304] ss:$24 sps:$4 sm:$0xff]  }
  0x1b   : > { %1506 = vmatpush1.bf16.msra.mxu1 %v2958_v25  ;;  %v3011_v59 = vld [vmem:[%s4149_s1 + $0x27c] ss:$24 sps:$4 sm:$0xff]   ;;  %v3521_v61 = vld [vmem:[%s3420_s10] ss:$16 sps:$4 sm:$0xff]   ;;  %v3017_v0 = vld [vmem:[%s4149_s1 + $0x2ac] ss:$24 sps:$4 sm:$0xff]  }
  0x1c   : > { %1422 = vmatpush1.bf16.msra.mxu0 %v2923_v16  ;;  %1507 = vmatprep.subr.bf16.mxu1 %v2960_v26  ;;  %v3016_v62 = vld [vmem:[%s4149_s1 + $0x278] ss:$24 sps:$4 sm:$0xff]   ;;  %v2991_v1 = vld [vmem:[%s4149_s1 + $0x334] ss:$24 sps:$4 sm:$0xff]   ;;  %v3022_v2 = vld [vmem:[%s4149_s1 + $0x2a8] ss:$24 sps:$4 sm:$0xff]  }
  0x1d   : > { %1423 = vmatprep.subr.bf16.mxu0 %v2924_v19  ;;  %v2982_v63 = vld [vmem:[%s4149_s1 + $0x300] ss:$24 sps:$4 sm:$0xff]   ;;  %v2989_v3 = vld [vmem:[%s4149_s1 + $0x330] ss:$24 sps:$4 sm:$0xff]   ;;  %v3023_v4 = vld [vmem:[%s4149_s1 + $0x2dc] ss:$24 sps:$4 sm:$0xff]  }
  0x1e   : > { %v2997_v5 = vld [vmem:[%s4149_s1 + $0x364] ss:$24 sps:$4 sm:$0xff]   ;;  %v3028_v6 = vld [vmem:[%s4149_s1 + $0x2d8] ss:$24 sps:$4 sm:$0xff]   ;;  %v3003_v9 = vld [vmem:[%s4149_s1 + $0x394] ss:$24 sps:$4 sm:$0xff]  }
  0x1f   : > { %1508 = vmatpush1.bf16.msra.mxu1 %v2964_v28  ;;  %v2995_v7 = vld [vmem:[%s4149_s1 + $0x360] ss:$24 sps:$4 sm:$0xff]   ;;  %v3031_v8 = vld [vmem:[%s4149_s1 + $0x30c] ss:$24 sps:$4 sm:$0xff]   ;;  %v3001_v11 = vld [vmem:[%s4149_s1 + $0x390] ss:$24 sps:$4 sm:$0xff]  }
  0x20   : > { %1424 = vmatpush1.bf16.msra.mxu0 %v2926_v21  ;;  %1509 = vmatprep.subr.bf16.mxu1 %v2966_v30  ;;  %v3029_v10 = vld [vmem:[%s4149_s1 + $0x308] ss:$24 sps:$4 sm:$0xff]   ;;  %v3037_v12 = vld [vmem:[%s4149_s1 + $0x33c] ss:$24 sps:$4 sm:$0xff]   ;;  %v3035_v15 = vld [vmem:[%s4149_s1 + $0x338] ss:$24 sps:$4 sm:$0xff]  }
  0x21   : > { %1425 = vmatprep.subr.bf16.mxu0 %v2927_v23  ;;  %v3009_v13 = vld [vmem:[%s4149_s1 + $0x3c4] ss:$24 sps:$4 sm:$0xff]   ;;  %v3007_v16 = vld [vmem:[%s4149_s1 + $0x3c0] ss:$24 sps:$4 sm:$0xff]   ;;  %v3015_v18 = vld [vmem:[%s4149_s1 + $0x3f4] ss:$24 sps:$4 sm:$0xff]  }
  0x22   : > { %v3574_v14 = vld [vmem:[%s3420_s10 + $0xc] ss:$16 sps:$4 sm:$0xff]   ;;  %v3041_v19 = vld [vmem:[%s4149_s1 + $0x368] ss:$24 sps:$4 sm:$0xff]   ;;  %v3047_v23 = vld [vmem:[%s4149_s1 + $0x398] ss:$24 sps:$4 sm:$0xff]  }
  0x23   : > { %1510 = vmatpush1.bf16.msra.mxu1 %v2970_v33  ;;  %v3043_v17 = vld [vmem:[%s4149_s1 + $0x36c] ss:$24 sps:$4 sm:$0xff]   ;;  %v3013_v20 = vld [vmem:[%s4149_s1 + $0x3f0] ss:$24 sps:$4 sm:$0xff]   ;;  %v3049_v21 = vld [vmem:[%s4149_s1 + $0x39c] ss:$24 sps:$4 sm:$0xff]  }
  0x24   : > { %1426 = vmatpush1.bf16.msra.mxu0 %v2929_v24  ;;  %1511 = vmatprep.subr.bf16.mxu1 %v2972_v35  ;;  %v3021_v22 = vld [vmem:[%s4149_s1 + $0x424] ss:$24 sps:$4 sm:$0xff]   ;;  %v3019_v24 = vld [vmem:[%s4149_s1 + $0x420] ss:$24 sps:$4 sm:$0xff]   ;;  %v3027_v26 = vld [vmem:[%s4149_s1 + $0x454] ss:$24 sps:$4 sm:$0xff]  }
  0x25   : > { %1427 = vmatprep.subr.bf16.mxu0 %v2932_v27  ;;  %v3055_v25 = vld [vmem:[%s4149_s1 + $0x3cc] ss:$24 sps:$4 sm:$0xff]   ;;  %v3053_v27 = vld [vmem:[%s4149_s1 + $0x3c8] ss:$24 sps:$4 sm:$0xff]  }
  0x26   : > { %v3025_v28 = vld [vmem:[%s4149_s1 + $0x450] ss:$24 sps:$4 sm:$0xff]   ;;  %v3034_v30 = vld [vmem:[%s4149_s1 + $0x484] ss:$24 sps:$4 sm:$0xff]   ;;  %v3032_v33 = vld [vmem:[%s4149_s1 + $0x480] ss:$24 sps:$4 sm:$0xff]  }
  0x27   : > { %1512 = vmatpush1.bf16.msra.mxu1 %v2976_v38  ;;  %v3040_v35 = vld [vmem:[%s4149_s1 + $0x4b4] ss:$24 sps:$4 sm:$0xff]  }
  0x28   : > { %1428 = vmatpush1.bf16.msra.mxu0 %v2935_v29  ;;  %1513 = vmatprep.subr.bf16.mxu1 %v2978_v39  ;;  %v3061_v29 = vld [vmem:[%s4149_s1 + $0x3fc] ss:$24 sps:$4 sm:$0xff]  }
  0x29   : > { %1429 = vmatprep.subr.bf16.mxu0 %v2938_v31  ;;  %v3059_v31 = vld [vmem:[%s4149_s1 + $0x3f8] ss:$24 sps:$4 sm:$0xff]   ;;  %v3073_v38 = vld [vmem:[%s4149_s1 + $0x45c] ss:$24 sps:$4 sm:$0xff]  }
  0x2a   : > { %v3046_v39 = vld [vmem:[%s4149_s1 + $0x4e4] ss:$24 sps:$4 sm:$0xff]  }
  0x2b   : > { %1514 = vmatpush1.bf16.msra.mxu1 %v2985_v41  ;;  %v3044_v41 = vld [vmem:[%s4149_s1 + $0x4e0] ss:$24 sps:$4 sm:$0xff]  }
  0x2c   : > { %1430 = vmatpush1.bf16.msra.mxu0 %v2941_v34  ;;  %1515 = vmatprep.subr.bf16.mxu1 %v2987_v43  ;;  %v3067_v34 = vld [vmem:[%s4149_s1 + $0x42c] ss:$24 sps:$4 sm:$0xff]  }
  0x2d   : > { %1431 = vmatprep.subr.bf16.mxu0 %v2944_v36  ;;  %v3065_v36 = vld [vmem:[%s4149_s1 + $0x428] ss:$24 sps:$4 sm:$0xff]   ;;  %v3052_v43 = vld [vmem:[%s4149_s1 + $0x514] ss:$24 sps:$4 sm:$0xff]  }
  0x2f   : > { %1516 = vmatpush1.bf16.msra.mxu1 %v2992_v46  ;;  %v3088_v46 = vld [vmem:[%s4149_s1 + $0x4bc] ss:$24 sps:$4 sm:$0xff]  }
  0x30   : > { %1432 = vmatpush1.bf16.msra.mxu0 %v2947_v37  ;;  %1517 = vmatprep.subr.bf16.mxu1 %v2993_v47  ;;  %v3038_v37 = vld [vmem:[%s4149_s1 + $0x4b0] ss:$24 sps:$4 sm:$0xff]   ;;  %v3058_v47 = vld [vmem:[%s4149_s1 + $0x544] ss:$24 sps:$4 sm:$0xff]  }
  0x31   : > { %1433 = vmatprep.subr.bf16.mxu0 %v2950_v40  ;;  %v3071_v40 = vld [vmem:[%s4149_s1 + $0x458] ss:$24 sps:$4 sm:$0xff]  }
  0x33   : > { %1518 = vmatpush1.bf16.msra.mxu1 %v2998_v49  ;;  %v3056_v49 = vld [vmem:[%s4149_s1 + $0x540] ss:$24 sps:$4 sm:$0xff]  }
  0x34   : > { %1434 = vmatpush1.bf16.msra.mxu0 %v2953_v42  ;;  %1519 = vmatprep.subr.bf16.mxu1 %v2999_v51  ;;  %v3082_v42 = vld [vmem:[%s4149_s1 + $0x48c] ss:$24 sps:$4 sm:$0xff]  }
  0x35   : > { %1435 = vmatprep.subr.bf16.mxu0 %v2956_v44  ;;  %v3080_v44 = vld [vmem:[%s4149_s1 + $0x488] ss:$24 sps:$4 sm:$0xff]   ;;  %v3064_v51 = vld [vmem:[%s4149_s1 + $0x574] ss:$24 sps:$4 sm:$0xff]  }
  0x37   : > { %1520 = vmatpush1.bf16.msra.mxu1 %v3004_v53  ;;  %v3062_v53 = vld [vmem:[%s4149_s1 + $0x570] ss:$24 sps:$4 sm:$0xff]  }
  0x38   : > { %1436 = vmatpush1.bf16.msra.mxu0 %v2959_v45  ;;  %1521 = vmatprep.subr.bf16.mxu1 %v3005_v55  ;;  %v3050_v45 = vld [vmem:[%s4149_s1 + $0x510] ss:$24 sps:$4 sm:$0xff]   ;;  %v3070_v55 = vld [vmem:[%s4149_s1 + $0x5a4] ss:$24 sps:$4 sm:$0xff]  }
  0x39   : > { %1437 = vmatprep.subr.bf16.mxu0 %v2962_v48  ;;  %v3086_v48 = vld [vmem:[%s4149_s1 + $0x4b8] ss:$24 sps:$4 sm:$0xff]  }
  0x3b   : > { %1522 = vmatpush1.bf16.msra.mxu1 %v3010_v57  ;;  %v3068_v57 = vld [vmem:[%s4149_s1 + $0x5a0] ss:$24 sps:$4 sm:$0xff]  }
  0x3c   : > { %1438 = vmatpush1.bf16.msra.mxu0 %v2965_v50  ;;  %1523 = vmatprep.subr.bf16.mxu1 %v3011_v59  ;;  %v3094_v50 = vld [vmem:[%s4149_s1 + $0x4ec] ss:$24 sps:$4 sm:$0xff]  }
  0x3d   : > { %1439 = vmatprep.subr.bf16.mxu0 %v2968_v52  ;;  %v3092_v52 = vld [vmem:[%s4149_s1 + $0x4e8] ss:$24 sps:$4 sm:$0xff]   ;;  %v3076_v59 = vld [vmem:[%s4149_s1 + $0x5d4] ss:$24 sps:$4 sm:$0xff]  }
  0x3f   : > { %1524 = vmatpush1.bf16.msra.mxu1 %v3016_v62  ;;  %v3074_v62 = vld [vmem:[%s4149_s1 + $0x5d0] ss:$24 sps:$4 sm:$0xff]  }
  0x40   : > { %1440 = vmatpush1.bf16.msra.mxu0 %v2971_v54  ;;  %1525 = vmatprep.subr.bf16.mxu1 %v3017_v0  ;;  %v3100_v54 = vld [vmem:[%s4149_s1 + $0x51c] ss:$24 sps:$4 sm:$0xff]  }
  0x41   : > { %1441 = vmatprep.subr.bf16.mxu0 %v2974_v56  ;;  %v3098_v56 = vld [vmem:[%s4149_s1 + $0x518] ss:$24 sps:$4 sm:$0xff]   ;;  %v3085_v0 = vld [vmem:[%s4149_s1 + $0x14] ss:$24 sps:$4 sm:$0xff]  }
  0x43   : > { %1526 = vmatpush1.bf16.msra.mxu1 %v3022_v2  ;;  %v3110_v2 = vld [vmem:[%s4149_s1 + $0x578] ss:$24 sps:$4 sm:$0xff]  }
  0x44   : > { %1442 = vmatpush1.bf16.msra.mxu0 %v2977_v58  ;;  %1527 = vmatprep.subr.bf16.mxu1 %v3023_v4  ;;  %v3106_v58 = vld [vmem:[%s4149_s1 + $0x54c] ss:$24 sps:$4 sm:$0xff]  }
  0x45   : > { %1454 = vmatprep.subr.bf16.mxu0 %v2984_v60  ;;  %v3104_v60 = vld [vmem:[%s4149_s1 + $0x548] ss:$24 sps:$4 sm:$0xff]   ;;  %v3118_v4 = vld [vmem:[%s4149_s1 + $0x5ac] ss:$24 sps:$4 sm:$0xff]  }
  0x47   : > { %1444 = vmatmul.mubr.bf16.vlgmr.msra.gmra.mrb[0].mxu0 %v3521_v61  ;;  %1528 = vmatpush1.bf16.msra.mxu1 %v3028_v6  ;;  %v3089_v6 = vld [vmem:[%s4149_s1 + $0x40] ss:$24 sps:$4 sm:$0xff]  }
  0x48   : > { %1455 = vmatpush1.bf16.msra.mxu0 %v2982_v63  ;;  %1540 = vmatprep.subr.bf16.mxu1 %v3031_v8  ;;  %v3112_v63 = vld [vmem:[%s4149_s1 + $0x57c] ss:$24 sps:$4 sm:$0xff]  }
  0x49   : > { %1456 = vmatprep.subr.bf16.mxu0 %v2991_v1  ;;  %1486 = vmatprep.mubr.bf16.mxu0 %v3574_v14  ;;  %v3723_v1 = vld [vmem:[%s3420_s10 + $0x8] ss:$16 sps:$4 sm:$0xff]   ;;  %v3124_v8 = vld [vmem:[%s4149_s1 + $0x5dc] ss:$24 sps:$4 sm:$0xff]   ;;  %s3279_s10 = smov 0.0  }
  0x4a   : > { %1530 = vmatmul.mubr.bf16.vlgmr.msra.gmra.mrb[0].mxu1 %v3521_v61 }
  0x4b   : > { %1541 = vmatpush1.bf16.msra.mxu1 %v3029_v10  ;;  %1572 = vmatprep.mubr.bf16.mxu1 %v3574_v14  ;;  %v3095_v10 = vld [vmem:[%s4149_s1 + $0x70] ss:$24 sps:$4 sm:$0xff]  }
  0x4c   : > { %1457 = vmatpush1.bf16.msra.mxu0 %v2989_v3  ;;  %1542 = vmatprep.subr.bf16.mxu1 %v3037_v12  ;;  %v3083_v3 = vld [vmem:[%s4149_s1 + $0x10] ss:$24 sps:$4 sm:$0xff]   ;;  %v3200_v12 = vld [vmem:[%s4150_s2 + $0x40] sm:$0xff]  }
  0x4d   : > { %1458 = vmatprep.subr.bf16.mxu0 %v2997_v5  ;;  %v3091_v5 = vld [vmem:[%s4149_s1 + $0x44] ss:$24 sps:$4 sm:$0xff]  }
  0x4f   : > { %1543 = vmatpush1.bf16.msra.mxu1 %v3035_v15  ;;  %v3201_v15 = vld [vmem:[%s4150_s2] sm:$0xff]  }
  0x50   : > { %1459 = vmatpush1.bf16.msra.mxu0 %v2995_v7  ;;  %1544 = vmatprep.subr.bf16.mxu1 %v3043_v17  ;;  %v3116_v7 = vld [vmem:[%s4149_s1 + $0x5a8] ss:$24 sps:$4 sm:$0xff]   ;;  %v3109_v17 = vld [vmem:[%s4149_s1 + $0xd4] ss:$24 sps:$4 sm:$0xff]  }
  0x51   : > { %1460 = vmatprep.subr.bf16.mxu0 %v3003_v9  ;;  %v3097_v9 = vld [vmem:[%s4149_s1 + $0x74] ss:$24 sps:$4 sm:$0xff]  }
  0x53   : > { %1545 = vmatpush1.bf16.msra.mxu1 %v3041_v19  ;;  %v3203_v19 = vld [vmem:[%s4150_s2 + $0x8] sm:$0xff]  }
  0x54   : > { %1461 = vmatpush1.bf16.msra.mxu0 %v3001_v11  ;;  %1546 = vmatprep.subr.bf16.mxu1 %v3049_v21  ;;  %v3122_v11 = vld [vmem:[%s4149_s1 + $0x5d8] ss:$24 sps:$4 sm:$0xff]  }
  0x55   : > { %1462 = vmatprep.subr.bf16.mxu0 %v3009_v13  ;;  %v3101_v13 = vld [vmem:[%s4149_s1 + $0xa0] ss:$24 sps:$4 sm:$0xff]   ;;  %v3204_v21 = vld [vmem:[%s4150_s2 + $0x50] sm:$0xff]  }
  0x57   : > { %1547 = vmatpush1.bf16.msra.mxu1 %v3047_v23  ;;  %v3113_v23 = vld [vmem:[%s4149_s1 + $0x100] ss:$24 sps:$4 sm:$0xff]  }
  0x58   : > { %1463 = vmatpush1.bf16.msra.mxu0 %v3007_v16  ;;  %1548 = vmatprep.subr.bf16.mxu1 %v3055_v25  ;;  %v3202_v16 = vld [vmem:[%s4150_s2 + $0x48] sm:$0xff]  }
  0x59   : > { %1464 = vmatprep.subr.bf16.mxu0 %v3015_v18  ;;  %v3107_v18 = vld [vmem:[%s4149_s1 + $0xd0] ss:$24 sps:$4 sm:$0xff]   ;;  %v3121_v25 = vld [vmem:[%s4149_s1 + $0x134] ss:$24 sps:$4 sm:$0xff]  }
  0x5b   : > { %1549 = vmatpush1.bf16.msra.mxu1 %v3053_v27  ;;  %v3119_v27 = vld [vmem:[%s4149_s1 + $0x130] ss:$24 sps:$4 sm:$0xff]  }
  0x5c   : > { %1465 = vmatpush1.bf16.msra.mxu0 %v3013_v20  ;;  %1550 = vmatprep.subr.bf16.mxu1 %v3061_v29  ;;  %v3115_v20 = vld [vmem:[%s4149_s1 + $0x104] ss:$24 sps:$4 sm:$0xff]  }
  0x5d   : > { %1466 = vmatprep.subr.bf16.mxu0 %v3021_v22  ;;  %v3205_v22 = vld [vmem:[%s4150_s2 + $0x10] sm:$0xff]   ;;  %v3127_v29 = vld [vmem:[%s4149_s1 + $0x164] ss:$24 sps:$4 sm:$0xff]  }
  0x5f   : > { %1551 = vmatpush1.bf16.msra.mxu1 %v3059_v31  ;;  %v3125_v31 = vld [vmem:[%s4149_s1 + $0x160] ss:$24 sps:$4 sm:$0xff]  }
  0x60   : > { %1467 = vmatpush1.bf16.msra.mxu0 %v3019_v24  ;;  %1552 = vmatprep.subr.bf16.mxu1 %v3067_v34  ;;  %v3206_v24 = vld [vmem:[%s4150_s2 + $0x58] sm:$0xff]   ;;  %v3130_v34 = vld [vmem:[%s4149_s1 + $0x194] ss:$24 sps:$4 sm:$0xff]  }
  0x61   : > { %1468 = vmatprep.subr.bf16.mxu0 %v3027_v26  ;;  %v3207_v26 = vld [vmem:[%s4150_s2 + $0x18] sm:$0xff]  }
  0x63   : > { %1553 = vmatpush1.bf16.msra.mxu1 %v3065_v36  ;;  %v3128_v36 = vld [vmem:[%s4149_s1 + $0x190] ss:$24 sps:$4 sm:$0xff]  }
  0x64   : > { %1469 = vmatpush1.bf16.msra.mxu0 %v3025_v28  ;;  %1554 = vmatprep.subr.bf16.mxu1 %v3073_v38  ;;  %v3208_v28 = vld [vmem:[%s4150_s2 + $0x60] sm:$0xff]  }
  0x65   : > { %1470 = vmatprep.subr.bf16.mxu0 %v3034_v30  ;;  %v3209_v30 = vld [vmem:[%s4150_s2 + $0x20] sm:$0xff]  }
  0x66   : > { %v3131_v38 = vld [vmem:[%s4149_s1 + $0x1c0] ss:$24 sps:$4 sm:$0xff]  }
  0x67   : > { %1555 = vmatpush1.bf16.msra.mxu1 %v3071_v40  ;;  %v3134_v40 = vld [vmem:[%s4149_s1 + $0x1f0] ss:$24 sps:$4 sm:$0xff]  }
  0x68   : > { %1471 = vmatpush1.bf16.msra.mxu0 %v3032_v33  ;;  %1556 = vmatprep.subr.bf16.mxu1 %v3082_v42  ;;  %v3210_v33 = vld [vmem:[%s4150_s2 + $0x68] sm:$0xff]   ;;  %v3137_v42 = vld [vmem:[%s4149_s1 + $0x220] ss:$24 sps:$4 sm:$0xff]  }
  0x69   : > { %1472 = vmatprep.subr.bf16.mxu0 %v3040_v35  ;;  %v3211_v35 = vld [vmem:[%s4150_s2 + $0x28] sm:$0xff]  }
  0x6b   : > { %1557 = vmatpush1.bf16.msra.mxu1 %v3080_v44  ;;  %v3140_v44 = vld [vmem:[%s4149_s1 + $0x250] ss:$24 sps:$4 sm:$0xff]  }
  0x6c   : > { %1473 = vmatpush1.bf16.msra.mxu0 %v3038_v37  ;;  %1558 = vmatprep.subr.bf16.mxu1 %v3088_v46  ;;  %v3133_v37 = vld [vmem:[%s4149_s1 + $0x1c4] ss:$24 sps:$4 sm:$0xff]   ;;  %v3143_v46 = vld [vmem:[%s4149_s1 + $0x280] ss:$24 sps:$4 sm:$0xff]  }
  0x6d   : > { %1474 = vmatprep.subr.bf16.mxu0 %v3046_v39  ;;  %v3136_v39 = vld [vmem:[%s4149_s1 + $0x1f4] ss:$24 sps:$4 sm:$0xff]  }
  0x6f   : > { %1559 = vmatpush1.bf16.msra.mxu1 %v3086_v48  ;;  %v3146_v48 = vld [vmem:[%s4149_s1 + $0x2b0] ss:$24 sps:$4 sm:$0xff]  }
  0x70   : > { %1475 = vmatpush1.bf16.msra.mxu0 %v3044_v41  ;;  %1560 = vmatprep.subr.bf16.mxu1 %v3094_v50  ;;  %v3139_v41 = vld [vmem:[%s4149_s1 + $0x224] ss:$24 sps:$4 sm:$0xff]   ;;  %v3149_v50 = vld [vmem:[%s4149_s1 + $0x2e0] ss:$24 sps:$4 sm:$0xff]  }
  0x71   : > { %1476 = vmatprep.subr.bf16.mxu0 %v3052_v43  ;;  %v3142_v43 = vld [vmem:[%s4149_s1 + $0x254] ss:$24 sps:$4 sm:$0xff]  }
  0x73   : > { %1561 = vmatpush1.bf16.msra.mxu1 %v3092_v52  ;;  %v3152_v52 = vld [vmem:[%s4149_s1 + $0x310] ss:$24 sps:$4 sm:$0xff]  }
  0x74   : > { %1477 = vmatpush1.bf16.msra.mxu0 %v3050_v45  ;;  %1562 = vmatprep.subr.bf16.mxu1 %v3100_v54  ;;  %v3145_v45 = vld [vmem:[%s4149_s1 + $0x284] ss:$24 sps:$4 sm:$0xff]   ;;  %v3155_v54 = vld [vmem:[%s4149_s1 + $0x340] ss:$24 sps:$4 sm:$0xff]  }
  0x75   : > { %1478 = vmatprep.subr.bf16.mxu0 %v3058_v47  ;;  %v3148_v47 = vld [vmem:[%s4149_s1 + $0x2b4] ss:$24 sps:$4 sm:$0xff]  }
  0x77   : > { %1563 = vmatpush1.bf16.msra.mxu1 %v3098_v56  ;;  %v3158_v56 = vld [vmem:[%s4149_s1 + $0x370] ss:$24 sps:$4 sm:$0xff]  }
  0x78   : > { %1479 = vmatpush1.bf16.msra.mxu0 %v3056_v49  ;;  %1564 = vmatprep.subr.bf16.mxu1 %v3106_v58  ;;  %v3151_v49 = vld [vmem:[%s4149_s1 + $0x2e4] ss:$24 sps:$4 sm:$0xff]   ;;  %v3164_v58 = vld [vmem:[%s4149_s1 + $0x3d0] ss:$24 sps:$4 sm:$0xff]  }
  0x79   : > { %1480 = vmatprep.subr.bf16.mxu0 %v3064_v51  ;;  %v3154_v51 = vld [vmem:[%s4149_s1 + $0x314] ss:$24 sps:$4 sm:$0xff]  }
  0x7b   : > { %1565 = vmatpush1.bf16.msra.mxu1 %v3104_v60  ;;  %v3167_v60 = vld [vmem:[%s4149_s1 + $0x400] ss:$24 sps:$4 sm:$0xff]  }
  0x7c   : > { %1481 = vmatpush1.bf16.msra.mxu0 %v3062_v53  ;;  %1566 = vmatprep.subr.bf16.mxu1 %v3112_v63  ;;  %v3157_v53 = vld [vmem:[%s4149_s1 + $0x344] ss:$24 sps:$4 sm:$0xff]   ;;  %v3172_v63 = vld [vmem:[%s4149_s1 + $0x434] ss:$24 sps:$4 sm:$0xff]  }
  0x7d   : > { %1482 = vmatprep.subr.bf16.mxu0 %v3070_v55  ;;  %v3160_v55 = vld [vmem:[%s4149_s1 + $0x374] ss:$24 sps:$4 sm:$0xff]  }
  0x7f   : > { %1567 = vmatpush1.bf16.msra.mxu1 %v3110_v2  ;;  %v3170_v2 = vld [vmem:[%s4149_s1 + $0x430] ss:$24 sps:$4 sm:$0xff]  }
  0x80   : > { %1483 = vmatpush1.bf16.msra.mxu0 %v3068_v57  ;;  %1568 = vmatprep.subr.bf16.mxu1 %v3118_v4  ;;  %v3166_v57 = vld [vmem:[%s4149_s1 + $0x3d4] ss:$24 sps:$4 sm:$0xff]   ;;  %v3175_v4 = vld [vmem:[%s4149_s1 + $0x464] ss:$24 sps:$4 sm:$0xff]  }
  0x81   : > { %1484 = vmatprep.subr.bf16.mxu0 %v3076_v59  ;;  %v3169_v59 = vld [vmem:[%s4149_s1 + $0x404] ss:$24 sps:$4 sm:$0xff]  }
  0x83   : > { %1569 = vmatpush1.bf16.msra.mxu1 %v3116_v7  ;;  %v3216_v7 = vld [vmem:[%s4150_s2 + $0xc0] sm:$0xff]  }
  0x84   : > { %1485 = vmatpush1.bf16.msra.mxu0 %v3074_v62  ;;  %1570 = vmatprep.subr.bf16.mxu1 %v3124_v8  ;;  %v3212_v62 = vld [vmem:[%s4150_s2 + $0x70] sm:$0xff]  }
  0x85   : > { %1583 = vmatprep.subr.bf16.mxu0 %v3085_v0  ;;  %v3213_v0 = vld [vmem:[%s4150_s2 + $0x30] sm:$0xff]  }
  0x86   : > { %v3178_v8 = vld [vmem:[%s4149_s1 + $0x494] ss:$24 sps:$4 sm:$0xff]  }
  0x87   : > { %1487 = vmatmul.mubr.bf16.vlgmr.msra.gmra.mrb[0].mxu0 %v3723_v1  ;;  %1571 = vmatpush1.bf16.msra.mxu1 %v3122_v11  ;;  %v3179_v11 = vld [vmem:[%s4149_s1 + $0x4c0] ss:$24 sps:$4 sm:$0xff]  }
  0x88   : > { %1584 = vmatpush1.bf16.msra.mxu0 %v3083_v3  ;;  %1615 = vmatprep.mubr.bf16.mxu0 %v3432_v32  ;;  %v3103_v32 = vld [vmem:[%s4149_s1 + $0xa4] ss:$24 sps:$4 sm:$0xff]  }
  0x89   : > { %1585 = vmatprep.subr.bf16.mxu0 %v3091_v5  ;;  %2709 = vmatprep.subr.bf16.mxu1 %v3200_v12  ;;  %v3214_v3 = vld [vmem:[%s4150_s2 + $0x78] sm:$0xff]   ;;  %v3184_v12 = vld [vmem:[%s4149_s1 + $0x4f4] ss:$24 sps:$4 sm:$0xff]  }
  0x8a   : > { %1573 = vmatmul.mubr.bf16.vlgmr.msra.gmra.mrb[0].mxu1 %v3723_v1  ;;  %v3215_v5 = vld [vmem:[%s4150_s2 + $0x38] sm:$0xff]  }
  0x8b   : > { %2710 = vmatpush3.bf16.msra.mxu1 %v3201_v15  ;;  %v3185_v15 = vld [vmem:[%s4149_s1 + $0x520] ss:$24 sps:$4 sm:$0xff]  }
  0x8c   : > { %1586 = vmatpush1.bf16.msra.mxu0 %v3089_v6  ;;  %2711 = vmatprep.subr.bf16.mxu1 %v3202_v16  ;;  %v3173_v6 = vld [vmem:[%s4149_s1 + $0x460] ss:$24 sps:$4 sm:$0xff]   ;;  %v3190_v16 = vld [vmem:[%s4149_s1 + $0x554] ss:$24 sps:$4 sm:$0xff]  }
  0x8d   : > { %1587 = vmatprep.subr.bf16.mxu0 %v3097_v9  ;;  %v3176_v9 = vld [vmem:[%s4149_s1 + $0x490] ss:$24 sps:$4 sm:$0xff]  }
  0x8f   : > { %2712 = vmatpush3.bf16.msra.mxu1 %v3203_v19  ;;  %v3191_v19 = vld [vmem:[%s4149_s1 + $0x580] ss:$24 sps:$4 sm:$0xff]  }
  0x90   : > { %1588 = vmatpush1.bf16.msra.mxu0 %v3095_v10  ;;  %2713 = vmatprep.subr.bf16.mxu1 %v3204_v21  ;;  %v3181_v10 = vld [vmem:[%s4149_s1 + $0x4c4] ss:$24 sps:$4 sm:$0xff]   ;;  %v3194_v21 = vld [vmem:[%s4149_s1 + $0x5b0] ss:$24 sps:$4 sm:$0xff]  }
  0x91   : > { %1589 = vmatprep.subr.bf16.mxu0 %v3103_v32  ;;  %v3182_v32 = vld [vmem:[%s4149_s1 + $0x4f0] ss:$24 sps:$4 sm:$0xff]  }
  0x93   : > { %2714 = vmatpush3.bf16.msra.mxu1 %v3205_v22  ;;  %v3199_v22 = vld [vmem:[%s4149_s1 + $0x5e4] ss:$24 sps:$4 sm:$0xff]  }
  0x94   : > { %1590 = vmatpush1.bf16.msra.mxu0 %v3101_v13  ;;  %2715 = vmatprep.subr.bf16.mxu1 %v3206_v24  ;;  %v3187_v13 = vld [vmem:[%s4149_s1 + $0x524] ss:$24 sps:$4 sm:$0xff]  }
  0x95   : > { %1591 = vmatprep.subr.bf16.mxu0 %v3109_v17  ;;  %v3188_v17 = vld [vmem:[%s4149_s1 + $0x550] ss:$24 sps:$4 sm:$0xff]  }
  0x97   : > { %2716 = vmatpush3.bf16.msra.mxu1 %v3207_v26 }
  0x98   : > { %1592 = vmatpush1.bf16.msra.mxu0 %v3107_v18  ;;  %2717 = vmatprep.subr.bf16.mxu1 %v3208_v28  ;;  %v3193_v18 = vld [vmem:[%s4149_s1 + $0x584] ss:$24 sps:$4 sm:$0xff]  }
  0x99   : > { %1593 = vmatprep.subr.bf16.mxu0 %v3115_v20  ;;  %v3196_v20 = vld [vmem:[%s4149_s1 + $0x5b4] ss:$24 sps:$4 sm:$0xff]  }
  0x9b   : > { %2718 = vmatpush3.bf16.msra.mxu1 %v3209_v30 }
  0x9c   : > { %1594 = vmatpush1.bf16.msra.mxu0 %v3113_v23  ;;  %2719 = vmatprep.subr.bf16.mxu1 %v3210_v33  ;;  %v3197_v23 = vld [vmem:[%s4149_s1 + $0x5e0] ss:$24 sps:$4 sm:$0xff]  }
  0x9d   : > { %1595 = vmatprep.subr.bf16.mxu0 %v3121_v25 }
  0x9f   : > { %2720 = vmatpush3.bf16.msra.mxu1 %v3211_v35  ;;  %v3217_v35 = vld [vmem:[%s4150_s2 + $0x80] sm:$0xff]  }
  0xa0   : > { %1596 = vmatpush1.bf16.msra.mxu0 %v3119_v27  ;;  %2721 = vmatprep.subr.bf16.mxu1 %v3212_v62  ;;  %v3236_v62 = vld [vmem:[%s4150_s2 + $0x150] sm:$0xff]  }
  0xa1   : > { %1597 = vmatprep.subr.bf16.mxu0 %v3127_v29 }
  0xa3   : > { %2722 = vmatpush3.bf16.msra.mxu1 %v3213_v0  ;;  %v3238_v0 = vld [vmem:[%s4150_s2 + $0x158] sm:$0xff]  }
  0xa4   : > { %1598 = vmatpush1.bf16.msra.mxu0 %v3125_v31  ;;  %2723 = vmatprep.subr.bf16.mxu1 %v3214_v3  ;;  %v3240_v3 = vld [vmem:[%s4150_s2 + $0x160] sm:$0xff]  }
  0xa5   : > { %1599 = vmatprep.subr.bf16.mxu0 %v3130_v34 }
  0xa7   : > { %2724 = vmatpush3.bf16.msra.mxu1 %v3215_v5  ;;  %v3242_v5 = vld [vmem:[%s4150_s2 + $0x168] sm:$0xff]  }
  0xa8   : > { %1600 = vmatpush1.bf16.msra.mxu0 %v3128_v36  ;;  %2731 = vmatprep.subr.bf16.mxu1 %v3216_v7  ;;  %v3218_v36 = vld [vmem:[%s4150_s2 + $0xc8] sm:$0xff]   ;;  %v3244_v7 = vld [vmem:[%s4150_s2 + $0x170] sm:$0xff]  }
  0xa9   : > { %1601 = vmatprep.subr.bf16.mxu0 %v3133_v37  ;;  %v3220_v37 = vld [vmem:[%s4150_s2 + $0xd0] sm:$0xff]  }
  0xac   : > { %1602 = vmatpush1.bf16.msra.mxu0 %v3131_v38 }
  0xad   : > { %1603 = vmatprep.subr.bf16.mxu0 %v3136_v39 }
  0xb0   : > { %1604 = vmatpush1.bf16.msra.mxu0 %v3134_v40 }
  0xb1   : > { %1605 = vmatprep.subr.bf16.mxu0 %v3139_v41 }
  0xb4   : > { %1606 = vmatpush1.bf16.msra.mxu0 %v3137_v42 }
  0xb5   : > { %1607 = vmatprep.subr.bf16.mxu0 %v3142_v43  ;;  %v3221_v43 = vld [vmem:[%s4150_s2 + $0x90] sm:$0xff]  }
  0xb8   : > { %1608 = vmatpush1.bf16.msra.mxu0 %v3140_v44 }
  0xb9   : > { %1609 = vmatprep.subr.bf16.mxu0 %v3145_v45 }
  0xbc   : > { %1610 = vmatpush1.bf16.msra.mxu0 %v3143_v46  ;;  %v3222_v46 = vld [vmem:[%s4150_s2 + $0xd8] sm:$0xff]  }
  0xbd   : > { %1611 = vmatprep.subr.bf16.mxu0 %v3148_v47 }
  0xc0   : > { %1612 = vmatpush1.bf16.msra.mxu0 %v3146_v48 }
  0xc1   : > { %1613 = vmatprep.subr.bf16.mxu0 %v3151_v49 }
  0xc4   : > { %1614 = vmatpush1.bf16.msra.mxu0 %v3149_v50  ;;  %v3223_v50 = vld [vmem:[%s4150_s2 + $0x98] sm:$0xff]  }
  0xc5   : > { %1626 = vmatprep.subr.bf16.mxu0 %v3154_v51  ;;  %v3224_v51 = vld [vmem:[%s4150_s2 + $0xe0] sm:$0xff]  }
  0xc7   : > { %1616 = vmatmul.mubr.bf16.vlgmr.msra.gmra.mrb[4].mxu0 %v3521_v61  ;;  %v3163_v61 = vld [vmem:[%s4149_s1 + $0x3a4] ss:$24 sps:$4 sm:$0xff]  }
  0xc8   : > { %1627 = vmatpush1.bf16.msra.mxu0 %v3152_v52  ;;  %1658 = vmatprep.mubr.bf16.mxu0 %v3574_v14  ;;  %v3161_v14 = vld [vmem:[%s4149_s1 + $0x3a0] ss:$24 sps:$4 sm:$0xff]  }
  0xc9   : > { %1628 = vmatprep.subr.bf16.mxu0 %v3157_v53  ;;  %v3225_v52 = vld [vmem:[%s4150_s2 + $0xa0] sm:$0xff]   ;;  %v3226_v53 = vld [vmem:[%s4150_s2 + $0xe8] sm:$0xff]  }
  0xcc   : > { %1629 = vmatpush1.bf16.msra.mxu0 %v3155_v54  ;;  %v3227_v54 = vld [vmem:[%s4150_s2 + $0xa8] sm:$0xff]  }
  0xcd   : > { %1630 = vmatprep.subr.bf16.mxu0 %v3160_v55  ;;  %v3228_v55 = vld [vmem:[%s4150_s2 + $0xf0] sm:$0xff]  }
  0xd0   : > { %1631 = vmatpush1.bf16.msra.mxu0 %v3158_v56  ;;  %v3229_v56 = vld [vmem:[%s4150_s2 + $0xb0] sm:$0xff]  }
  0xd1   : > { %1632 = vmatprep.subr.bf16.mxu0 %v3163_v61  ;;  %v3230_v61 = vld [vmem:[%s4150_s2 + $0xf8] sm:$0xff]  }
  0xd4   : > { %1633 = vmatpush1.bf16.msra.mxu0 %v3161_v14  ;;  %v3231_v14 = vld [vmem:[%s4150_s2 + $0xb8] sm:$0xff]  }
  0xd5   : > { %1634 = vmatprep.subr.bf16.mxu0 %v3166_v57  ;;  %v3232_v57 = vld [vmem:[%s4150_s2 + $0x140] sm:$0xff]  }
  0xd8   : > { %1635 = vmatpush1.bf16.msra.mxu0 %v3164_v58  ;;  %v3233_v58 = vld [vmem:[%s4150_s2 + $0x100] sm:$0xff]  }
  0xd9   : > { %1636 = vmatprep.subr.bf16.mxu0 %v3169_v59  ;;  %v3234_v59 = vld [vmem:[%s4150_s2 + $0x148] sm:$0xff]  }
  0xdc   : > { %1637 = vmatpush1.bf16.msra.mxu0 %v3167_v60  ;;  %v3235_v60 = vld [vmem:[%s4150_s2 + $0x108] sm:$0xff]  }
  0xdd   : > { %1638 = vmatprep.subr.bf16.mxu0 %v3172_v63  ;;  %v3237_v63 = vld [vmem:[%s4150_s2 + $0x110] sm:$0xff]  }
  0xe0   : > { %1639 = vmatpush1.bf16.msra.mxu0 %v3170_v2  ;;  %v3239_v2 = vld [vmem:[%s4150_s2 + $0x118] sm:$0xff]  }
  0xe1   : > { %1640 = vmatprep.subr.bf16.mxu0 %v3175_v4  ;;  %v3241_v4 = vld [vmem:[%s4150_s2 + $0x120] sm:$0xff]  }
  0xe4   : > { %1641 = vmatpush1.bf16.msra.mxu0 %v3173_v6  ;;  %v3243_v6 = vld [vmem:[%s4150_s2 + $0x128] sm:$0xff]  }
  0xe5   : > { %1642 = vmatprep.subr.bf16.mxu0 %v3178_v8  ;;  %v3245_v8 = vld [vmem:[%s4150_s2 + $0x130] sm:$0xff]  }
  0xe8   : > { %1643 = vmatpush1.bf16.msra.mxu0 %v3176_v9  ;;  %v3246_v9 = vld [vmem:[%s4150_s2 + $0x178] sm:$0xff]  }
  0xe9   : > { %1644 = vmatprep.subr.bf16.mxu0 %v3181_v10  ;;  %v3247_v10 = vld [vmem:[%s4150_s2 + $0x138] sm:$0xff]  }
  0xec   : > { %1645 = vmatpush1.bf16.msra.mxu0 %v3179_v11 }
  0xed   : > { %1646 = vmatprep.subr.bf16.mxu0 %v3184_v12 }
  0xf0   : > { %1647 = vmatpush1.bf16.msra.mxu0 %v3182_v32 }
  0xf1   : > { %1648 = vmatprep.subr.bf16.mxu0 %v3187_v13 }
  0xf4   : > { %1649 = vmatpush1.bf16.msra.mxu0 %v3185_v15 }
  0xf5   : > { %1650 = vmatprep.subr.bf16.mxu0 %v3190_v16 }
  0xf8   : > { %1651 = vmatpush1.bf16.msra.mxu0 %v3188_v17 }
  0xf9   : > { %1652 = vmatprep.subr.bf16.mxu0 %v3193_v18 }
  0xfc   : > { %1653 = vmatpush1.bf16.msra.mxu0 %v3191_v19 }
  0xfd   : > { %1654 = vmatprep.subr.bf16.mxu0 %v3196_v20 }
 0x100   : > { %1655 = vmatpush1.bf16.msra.mxu0 %v3194_v21 }
 0x101   : > { %1656 = vmatprep.subr.bf16.mxu0 %v3199_v22 }
 0x104   : > { %1657 = vmatpush1.bf16.msra.mxu0 %v3197_v23 }
 0x107   : > { %1659 = vmatmul.mubr.bf16.vlgmr.msra.gmra.mrb[4].mxu0 %v3723_v1  ;;  %v3219_v1 = vld [vmem:[%s4150_s2 + $0x88] sm:$0xff]  }
 0x15a   : > { %v1488_v24 = vpop.f32.mrb[0].mxu0 }
 0x15b   : > { %v1490_v25 = vpop.f32.mrb[1].mxu0  ;;  %v1669_v27 = vmul.f32 %v1488_v24, %v1488_v24 }
 0x15c   : > { %v1492_v26 = vpop.f32.mrb[2].mxu0  ;;  %v1670_v30 = vmul.f32 %v1490_v25, %v1490_v25 }
 0x15d   : > { %v1675_v28 = vmul.f32 %v1492_v26, %v1492_v26  ;;  %v1494_v29 = vpop.f32.mrb[3].mxu0  ;;  %v1574_v38 = vpop.f32.mrb[0].mxu1 }
 0x15e   : > { %v1676_v31 = vmul.f32 %v1494_v29, %v1494_v29  ;;  %v1671_v39 = vmul.f32 %v1574_v38, %v1574_v38  ;;  %v1576_v40 = vpop.f32.mrb[1].mxu1 }
 0x15f   : > { %v1681_v33 = vpack.c.bf16 %v1675_v28, %v1669_v27  ;;  %v1672_v41 = vmul.f32 %v1576_v40, %v1576_v40  ;;  %v1578_v42 = vpop.f32.mrb[2].mxu1  ;;  %v3278_v27 = vmov -23.02585  }
 0x160   : > { %v1682_v34 = vpack.c.bf16 %v1676_v31, %v1670_v30  ;;  %v1677_v44 = vmul.f32 %v1578_v42, %v1578_v42  ;;  %v1580_v45 = vpop.f32.mrb[3].mxu1  ;;  %234 = vst [vmem:[#allocation3] sm:$0x1] %v3278_v27 }
 0x161   : > { %v1678_v47 = vmul.f32 %v1580_v45, %v1580_v45 }
 0x162   : > { %2103 = vmatprep.mubr.bf16.mxu1 %v1682_v34  ;;  %v1683_v48 = vpack.c.bf16 %v1677_v44, %v1671_v39 }
 0x163   : > { %2104 = vmatmul.mubr.bf16.vlgmr.msra.gmra.mrb[4].mxu1 %v1681_v33  ;;  %v1684_v49 = vpack.c.bf16 %v1678_v47, %v1672_v41 }
 0x164   : > { %2732 = vmatpush3.bf16.msra.mxu1 %v3217_v35 }
 0x165   : > { %2733 = vmatprep.subr.bf16.mxu1 %v3218_v36  ;;  %2144 = vmatprep.mubr.bf16.mxu1 %v1684_v49 }
 0x168   : > { %2734 = vmatpush3.bf16.msra.mxu1 %v3219_v1 }
 0x169   : > { %2735 = vmatprep.subr.bf16.mxu1 %v3220_v37 }
 0x16c   : > { %2736 = vmatpush3.bf16.msra.mxu1 %v3221_v43 }
 0x16d   : > { %2737 = vmatprep.subr.bf16.mxu1 %v3222_v46 }
 0x170   : > { %2738 = vmatpush3.bf16.msra.mxu1 %v3223_v50 }
 0x171   : > { %2739 = vmatprep.subr.bf16.mxu1 %v3224_v51 }
 0x174   : > { %2740 = vmatpush3.bf16.msra.mxu1 %v3225_v52 }
 0x175   : > { %2741 = vmatprep.subr.bf16.mxu1 %v3226_v53 }
 0x178   : > { %2742 = vmatpush3.bf16.msra.mxu1 %v3227_v54 }
 0x179   : > { %2743 = vmatprep.subr.bf16.mxu1 %v3228_v55 }
 0x17c   : > { %2744 = vmatpush3.bf16.msra.mxu1 %v3229_v56  ;;  %v2204_v56 = vld [vmem:[#allocation3] sm:$0x1] }
 0x17d   : > { %2745 = vmatprep.subr.bf16.mxu1 %v3230_v61 }
 0x180   : > { %2746 = vmatpush3.bf16.msra.mxu1 %v3231_v14 }
 0x181   : > { %2753 = vmatprep.subr.bf16.mxu1 %v3232_v57 }
 0x183   : > { %2145 = vmatmul.mubr.bf16.vlgmr.msra.gmra.mrb[8].mxu1 %v1683_v48 }
 0x184   : > { %2754 = vmatpush3.bf16.msra.mxu1 %v3233_v58 }
 0x185   : > { %2755 = vmatprep.subr.bf16.mxu1 %v3234_v59  ;;  %v2235_v59 = vld [vmem:[%s4151_s3] sm:$0xff] }
 0x188   : > { %2756 = vmatpush3.bf16.msra.mxu1 %v3235_v60  ;;  %v2236_v60 = vld [vmem:[%s4151_s3 + $0x8] sm:$0xff] }
 0x189   : > { %2757 = vmatprep.subr.bf16.mxu1 %v3236_v62  ;;  %v2237_v62 = vld [vmem:[%s4151_s3 + $0x10] sm:$0xff] }
 0x18c   : > { %2758 = vmatpush3.bf16.msra.mxu1 %v3237_v63  ;;  %v2828_v63 = vpack.c.bf16 %v2236_v60, %v2235_v59 }
 0x18d   : > { %2759 = vmatprep.subr.bf16.mxu1 %v3238_v0  ;;  %v2238_v0 = vld [vmem:[%s4151_s3 + $0x18] sm:$0xff] }
 0x190   : > { %2760 = vmatpush3.bf16.msra.mxu1 %v3239_v2  ;;  %v2832_v2 = vpack.c.bf16 %v2238_v0, %v2237_v62 }
 0x191   : > { %2761 = vmatprep.subr.bf16.mxu1 %v3240_v3  ;;  %v2239_v3 = vld [vmem:[%s4151_s3 + $0x20] sm:$0xff] }
 0x194   : > { %2762 = vmatpush3.bf16.msra.mxu1 %v3241_v4  ;;  %v2240_v4 = vld [vmem:[%s4151_s3 + $0x28] sm:$0xff] }
 0x195   : > { %2763 = vmatprep.subr.bf16.mxu1 %v3242_v5  ;;  %v2836_v5 = vpack.c.bf16 %v2240_v4, %v2239_v3 }
 0x198   : > { %2764 = vmatpush3.bf16.msra.mxu1 %v3243_v6  ;;  %v2241_v6 = vld [vmem:[%s4151_s3 + $0x30] sm:$0xff] }
 0x199   : > { %2765 = vmatprep.subr.bf16.mxu1 %v3244_v7  ;;  %v2242_v7 = vld [vmem:[%s4151_s3 + $0x38] sm:$0xff] }
 0x19c   : > { %2766 = vmatpush3.bf16.msra.mxu1 %v3245_v8  ;;  %v2840_v8 = vpack.c.bf16 %v2242_v7, %v2241_v6 }
 0x19d   : > { %2767 = vmatprep.subr.bf16.mxu1 %v3246_v9  ;;  %v2243_v9 = vld [vmem:[%s4151_s3 + $0x40] sm:$0xff] }
 0x1a0   : > { %2768 = vmatpush3.bf16.msra.mxu1 %v3247_v10  ;;  %v2244_v10 = vld [vmem:[%s4151_s3 + $0x48] sm:$0xff] }
 0x1a1   : > { %2829 = vmatprep.subr.bf16.mxu1 %v2828_v63 }
 0x1da   : > { %v1660_v11 = vpop.f32.mrb[4].mxu0 }
 0x1db   : > { %v1662_v12 = vpop.f32.mrb[5].mxu0  ;;  %v1673_v13 = vmul.f32 %v1660_v11, %v1660_v11  ;;  %v2844_v11 = vpack.c.bf16 %v2244_v10, %v2243_v9 }
 0x1dc   : > { %v1664_v32 = vpop.f32.mrb[6].mxu0  ;;  %v1674_v17 = vmul.f32 %v1662_v12, %v1662_v12  ;;  %v2245_v12 = vld [vmem:[%s4151_s3 + $0x50] sm:$0xff] }
 0x1dd   : > { %v1679_v15 = vmul.f32 %v1664_v32, %v1664_v32  ;;  %v1666_v16 = vpop.f32.mrb[7].mxu0  ;;  %v2246_v32 = vld [vmem:[%s4151_s3 + $0x58] sm:$0xff] }
 0x1de   : > { %v1680_v18 = vmul.f32 %v1666_v16, %v1666_v16  ;;  %v2248_v16 = vld [vmem:[%s4151_s3 + $0x68] sm:$0xff] }
 0x1df   : > { %v1685_v19 = vpack.c.bf16 %v1679_v15, %v1673_v13  ;;  %v2848_v13 = vpack.c.bf16 %v2246_v32, %v2245_v12  ;;  %v2247_v15 = vld [vmem:[%s4151_s3 + $0x60] sm:$0xff] }
 0x1e0   : > { %v1686_v20 = vpack.c.bf16 %v1680_v18, %v1674_v17  ;;  %v2852_v17 = vpack.c.bf16 %v2248_v16, %v2247_v15  ;;  %v2249_v18 = vld [vmem:[%s4151_s3 + $0x70] sm:$0xff] }
 0x1e2   : > { %2185 = vmatprep.mubr.bf16.mxu1 %v1686_v20 }
 0x1e3   : > { %2186 = vmatmul.mubr.bf16.vlgmr.msra.gmra.mrb[12].mxu1 %v1685_v19  ;;  %v2250_v19 = vld [vmem:[%s4151_s3 + $0x78] sm:$0xff] }
 0x1e4   : > { %2831 = vmatpush3.bf16.msra.mxu1 %v2828_v63  ;;  %v2856_v20 = vpack.c.bf16 %v2250_v19, %v2249_v18 }
 0x1e5   : > { %2833 = vmatprep.subr.bf16.mxu1 %v2832_v2 }
 0x1e8   : > { %2835 = vmatpush3.bf16.msra.mxu1 %v2832_v2 }
 0x1e9   : > { %2837 = vmatprep.subr.bf16.mxu1 %v2836_v5 }
 0x1ec   : > { %2839 = vmatpush3.bf16.msra.mxu1 %v2836_v5 }
 0x1ed   : > { %2841 = vmatprep.subr.bf16.mxu1 %v2840_v8 }
 0x1f0   : > { %2843 = vmatpush3.bf16.msra.mxu1 %v2840_v8 }
 0x1f1   : > { %2845 = vmatprep.subr.bf16.mxu1 %v2844_v11 }
 0x1f4   : > { %2847 = vmatpush3.bf16.msra.mxu1 %v2844_v11 }
 0x1f5   : > { %2849 = vmatprep.subr.bf16.mxu1 %v2848_v13 }
 0x1f8   : > { %2851 = vmatpush3.bf16.msra.mxu1 %v2848_v13 }
 0x1f9   : > { %2853 = vmatprep.subr.bf16.mxu1 %v2852_v17 }
 0x1fc   : > { %2855 = vmatpush3.bf16.msra.mxu1 %v2852_v17 }
 0x1fd   : > { %2857 = vmatprep.subr.bf16.mxu1 %v2856_v20 }
 0x200   : > { %2859 = vmatpush3.bf16.msra.mxu1 %v2856_v20 }
 0x236   : > { %v2725_v21 = vpop.f32.mrb[4].mxu1 }
 0x237   : > { %v2726_v22 = vpop.f32.mrb[5].mxu1 }
 0x238   : > { %v2727_v23 = vadd.f32 %v2726_v22, %v2725_v21  ;;  %v2728_v24 = vpop.f32.mrb[6].mxu1 }
 0x239   : > { %v2729_v25 = vpop.f32.mrb[7].mxu1 }
 0x23a   : > { %v2730_v26 = vadd.f32 %v2729_v25, %v2728_v24 }
 0x256   : > { %v2747_v28 = vpop.f32.mrb[8].mxu1 }
 0x257   : > { %v2748_v29 = vpop.f32.mrb[9].mxu1 }
 0x258   : > { %v2749_v30 = vadd.f32 %v2748_v29, %v2747_v28  ;;  %v2750_v31 = vpop.f32.mrb[10].mxu1 }
 0x259   : > { %v2751_v33 = vpop.f32.mrb[11].mxu1 }
 0x25a   : > { %v2147_v34 = vadd.f32 %v2749_v30, %v2727_v23  ;;  %v2752_v35 = vadd.f32 %v2751_v33, %v2750_v31  ;;  %v2326_v31 = vlaneseq }
 0x25c   : > { %v2150_v36 = vadd.f32 %v2752_v35, %v2730_v26  ;;  %v2327_v33 = vshrl.u32 %v2326_v31, 7 }
 0x25e   : > { %v2328_v35 = vadd.s32 8, %v2327_v33 }
 0x260   : > { %vm2332_vm2 = vcmp.lt.s32.totalorder %v2328_v35, 11 }
 0x2b6   : > { %v2769_v1 = vpop.f32.mrb[12].mxu1 }
 0x2b7   : > { %v2770_v37 = vpop.f32.mrb[13].mxu1 }
 0x2b8   : > { %v2771_v38 = vadd.f32 %v2770_v37, %v2769_v1  ;;  %v2772_v39 = vpop.f32.mrb[14].mxu1 }
 0x2b9   : > { %v2773_v40 = vpop.f32.mrb[15].mxu1 }
 0x2ba   : > { %v2188_v41 = vadd.f32 %v2771_v38, %v2147_v34  ;;  %v2774_v42 = vadd.f32 %v2773_v40, %v2772_v39  ;;  %v2330_v34 = vand.u32 127, %v2326_v31 }
 0x2bc   : > { %v2194_v43 = vmax.f32 %v2188_v41, 1e-10  ;;  %v2191_v44 = vadd.f32 %v2774_v42, %v2150_v36  ;;  %vm2333_vm1 = vcmp.lt.s32.totalorder %v2330_v34, 20 }
 0x2bd   : > { %vm2335_vm3 = vmand %vm2332_vm2, %vm2333_vm1 }
 0x2be   : > { %3248 = vlog2.f32 %v2194_v43  ;;  %v2195_v45 = vmax.f32 %v2191_v44, 1e-10 }
 0x2c0   : > { %3250 = vlog2.f32 %v2195_v45 }
 0x2c8   : > { %v3249_v46 = vpop.eup %3248 }
 0x2c9   : > { %v4079_v48 = vmul.f32 0.6931472, %v3249_v46 }
 0x2ca   : > { %v3251_v47 = vpop.eup %3250 }
 0x2cb   : > { %v4081_v49 = vmul.f32 0.6931472, %v3251_v47 }
 0x2cd   : > { %v2205_v50 = vmax.f32 %v4079_v48, %v4081_v49 }
 0x2cf   : > { %v2206_v51 = vrot.slane %v2205_v50, 4 }
 0x2d1   : > { %v2207_v52 = vmax.f32 %v2205_v50, %v2206_v51 }
 0x2d3   : > { %v2208_v53 = vrot.slane %v2207_v52, 2 }
 0x2d5   : > { %v2209_v54 = vmax.f32 %v2207_v52, %v2208_v53 }
 0x2d7   : > { %v2210_v55 = vrot.slane %v2209_v54, 1 }
 0x2d9   : > { %v2211_v61 = vmax.f32 %v2209_v54, %v2210_v55 }
 0x2db   : > { %v2212_v14 = vmax.f32 %v2204_v56, %v2211_v61 }
 0x2dd   : > { %2213 = vst [vmem:[#allocation3] sm:$0x1] %v2212_v14 }
 0x2e4   : > { %v2219_v57 = vld [vmem:[#allocation3] sm:$0x1] }
 0x2e5   : > { %v2221_v58 = vsel %vm2220_vm0, %v2219_v57, -inf }
 0x2e6   : > { %2222 = vmax.xlane.f32.xlu0 %v2221_v58 }
 0x373   : > { %v2223_v21 = vpop.xlane.xlu0 %2222 }
 0x374   : > { %v2224_v22 = vrot.slane %v2223_v21, 4 }
 0x376   : > { %v2225_v23 = vmax.f32 %v2223_v21, %v2224_v22 }
 0x378   : > { %v2226_v24 = vrot.slane %v2225_v23, 2 }
 0x37a   : > { %v2227_v25 = vmax.f32 %v2225_v23, %v2226_v24 }
 0x37c   : > { %v2228_v26 = vrot.slane %v2227_v25, 1 }
 0x37e   : > { %v2229_v27 = vmax.f32 %v2227_v25, %v2228_v26 }
 0x380   : > { %2872 = vpush %v2229_v27 }
 0x3b1   : > { %s2873_s12 = spop %2872 }
 0x3b2   : > { %s2704_s13 = sadd.f32 -18.420681, %s2873_s12 }
 0x3b4   : > { %v2232_v28 = vstv %s2704_s13 }
 0x3b5   : > { %v2233_v29 = vmax.f32 %v4079_v48, %v2232_v28  ;;  %v2234_v30 = vmax.f32 %v4081_v49, %v2232_v28 }
 0x3b7   : > { %2825 = vmatprep.mubr.f32.mxu1 %v2233_v29 }
 0x3b8   : > { %2826 = vmatmul.mubr.f32.vlgmr.msra.gmra.mrb[16].mxu1 %v2234_v30 }
 0x48b   : > { %v2827_v36 = vpop.f32.mrb[16].mxu1 }
 0x48c   : > { %v2317_v1 = vpop.f32.mrb[17].mxu1  ;;  %v2337_v37 = vsel %vm2335_vm3, %v2827_v36, 0.0 }
 0x48d   : > { %v2336_v38 = vsel %vm2333_vm1, %v2317_v1, 0.0  ;;  %v2350_v39 = vmul.f32 %v2827_v36, %v2337_v37 }
 0x48e   : > { %v2349_v40 = vmul.f32 %v2336_v38, %v2317_v1  ;;  %v2338_v41 = vadd.f32 %v2337_v37, %v2336_v38 }
 0x490   : > { %2339 = vadd.xlane.f32.xlu0 %v2338_v41  ;;  %v2351_v42 = vadd.f32 %v2350_v39, %v2349_v40 }
 0x492   : > { %2352 = vadd.xlane.f32.xlu1 %v2351_v42 }
 0x51d   : > { %v2340_v43 = vpop.xlane.xlu0 %2339 }
 0x51e   : > { %v2341_v44 = vrot.slane %v2340_v43, 4 }
 0x51f   : > { %v2353_v45 = vpop.xlane.xlu1 %2352 }
 0x520   : > { %v2342_v46 = vadd.f32 %v2341_v44, %v2340_v43  ;;  %v2354_v47 = vrot.slane %v2353_v45, 4 }
 0x522   : > { %v2343_v48 = vrot.slane %v2342_v46, 2  ;;  %v2355_v49 = vadd.f32 %v2354_v47, %v2353_v45 }
 0x524   : > { %v2344_v50 = vadd.f32 %v2343_v48, %v2342_v46  ;;  %v2356_v51 = vrot.slane %v2355_v49, 2 }
 0x526   : > { %v2357_v52 = vadd.f32 %v2356_v51, %v2355_v49  ;;  %v2345_v53 = vrot.slane %v2344_v50, 1 }
 0x528   : > { %v2346_v54 = vadd.f32 %v2345_v53, %v2344_v50  ;;  %v2358_v55 = vrot.slane %v2357_v52, 1 }
 0x52a   : > { %2874 = vpush %v2346_v54  ;;  %v2359_v56 = vadd.f32 %v2358_v55, %v2357_v52 }
 0x52c   : > { %2876 = vpush %v2359_v56 }
 0x55b   : > { %s2875_s14 = spop %2874 }
 0x55c   : > { %s2348_s19 = smul.f32 0.0045454544, %s2875_s14 }
 0x55d   : > { %s2877_s20 = spop %2876 }
 0x55e   : > { %s2362_s21 = smul.f32 %s2348_s19, %s2348_s19  ;;  %v2365_v61 = vstv %s2348_s19 }
 0x55f   : > { %s2361_s22 = smul.f32 0.0045454544, %s2877_s20  ;;  %v2366_v14 = vsub.f32 %v2317_v1, %v2365_v61  ;;  %v2367_v57 = vsub.f32 %v2827_v36, %v2365_v61 }
 0x561   : > { %s2363_s23 = ssub.f32 %s2361_s22, %s2362_s21 }
 0x563   : > { %s2364_s24 = smax.f32 %s3279_s10, %s2363_s23 }
 0x564   : > { %s2368_s25 = sadd.f32 1e-05, %s2364_s24 }
 0x566   : > { %v2369_v58 = vstv %s2368_s25 }
 0x567   : > { %3252 = vrsqrt.f32 %v2369_v58 }
 0x571   : > { %v3253_v59 = vpop.eup %3252 }
 0x572   : > { %2878 = vpush %v3253_v59 }
 0x5a3   : > { %s2879_s27 = spop %2878 }
 0x5a4   : > { %v2372_v60 = vstv %s2879_s27 }
 0x5a5   : > { %v2373_v62 = vmul.f32 %v2372_v60, %v2366_v14  ;;  %v2374_v63 = vmul.f32 %v2372_v60, %v2367_v57 }
 0x5a7   : > { %2375 = vst [vmem:[%s228_s30] sm:$0xff] %v2373_v62  ;;  %2376 = vst [vmem:[%s228_s30 + $0x8] sm:$0xff] %v2374_v63 }
 0x5a8 PF: > { %s14_s17 = sadd.s32 1, %s3276_s17   ;;  %s4153_s15 = smov %s3272_s16 }
 0x5a9   : > { %p11_p5 = scmp.ge.s32.totalorder %s14_s17, 4   ;;  %s4154_s16 = smov %s4156_s18 }
 0x5ab   :  { %13 = sbr.rel (!%p11_p5) target bundleno = 2 (0x2), region = 75 }

</bundles_post_ra>
